<compile_context>
chip_gen: v7x
topology: tpu7x:2x2x1
jax: 0.10.0
libtpu: 0.0.40
codegen_flags: <defaults>
</compile_context>

<pallas_src>
from functools import partial

import numpy as np
import jax
import jax.numpy as jnp
from jax.experimental import pallas as pl
from jax.experimental.pallas import tpu as pltpu

D_HID = 128      # size_dict['small'][1]
D_ATT = 64       # size_dict['small'][2]
CPAD = 128       # attention-head columns padded to a full lane width
NEG_BIG = -1e30  # finite "-inf" (avoids inf-inf NaNs in the online softmax)


def _main_kernel(store_det_logit,
                 n_ref,
                 x_ref, w1_ref, b1_ref, wab_ref, bab_ref, wc_ref, bc_ref,
                 wcls_ref, bcls_ref,
                 p_ref, mtile_ref, m_ref, invl_ref, cls_logit_ref, y_prob_ref,
                 *rest):
    if store_det_logit:
        det_logit_ref, m_s, l_s, acc_s = rest
    else:
        det_logit_ref = None
        m_s, l_s, acc_s = rest

    i = pl.program_id(0)

    @pl.when(i == 0)
    def _init():
        m_s[...] = jnp.full(m_s.shape, NEG_BIG, m_s.dtype)
        l_s[...] = jnp.zeros(l_s.shape, l_s.dtype)
        acc_s[...] = jnp.zeros(acc_s.shape, acc_s.dtype)

    tn = x_ref.shape[0]
    x = x_ref[...]                                                 # (TN, F) bf16

    # det_net hidden layer: Linear(F->128) + ReLU (bf16 MXU, f32 accumulate)
    h1 = jnp.dot(x, w1_ref[...], preferred_element_type=jnp.float32) + b1_ref[...]
    h1 = jnp.maximum(h1, 0.0)                                      # (TN, 128) f32
    h1_bf = h1.astype(jnp.bfloat16)

    # gated attention: single fused (128,128) matmul, split into tanh/sigmoid halves
    ab = jnp.dot(h1_bf, wab_ref[...],
                 preferred_element_type=jnp.float32) + bab_ref[...]   # (TN, 128)
    a = jnp.tanh(ab[:, :D_ATT])
    b = jax.nn.sigmoid(ab[:, D_ATT:])
    g = (a * b).astype(jnp.bfloat16)                               # (TN, 64)

    logits = jnp.dot(g, wc_ref[...],
                     preferred_element_type=jnp.float32) + bc_ref[...]  # (TN, CPAD)

    if store_det_logit:
        det_logit_ref[...] = logits.astype(jnp.bfloat16)

    # mask padded instances so they vanish from the softmax / aggregation.
    # (TN,1) predicate broadcast into a single select -- cheap on the VPU.
    n_valid = n_ref[0]
    row = i * tn + jax.lax.broadcasted_iota(jnp.int32, (tn, 1), 0)
    logits = jnp.where(row < n_valid, logits, NEG_BIG)

    # flash-style online softmax (over the instance axis) + feature aggregation
    m_old = m_s[...]                                               # (1, CPAD)
    m_new = jnp.maximum(m_old, jnp.max(logits, axis=0, keepdims=True))
    alpha = jnp.exp(m_old - m_new)                                 # (1, CPAD)
    p = jnp.exp(logits - m_new)                                    # (TN, CPAD), <= 1
    p_bf = p.astype(jnp.bfloat16)
    p_ref[...] = p_bf                                              # pass-2 input
    mtile_ref[...] = m_new[None]                                   # (1,1,CPAD) snapshot
    l_s[...] = alpha * l_s[...] + jnp.sum(p, axis=0, keepdims=True)
    # h.T @ p without an explicit transpose: contract dim 0 of both operands.
    # (p kept bf16 for the MXU; acceptable at the stated tolerances.)
    acc_s[...] = alpha * acc_s[...] + jax.lax.dot_general(
        h1_bf, p_bf,
        dimension_numbers=(((0,), (0,)), ((), ())),
        preferred_element_type=jnp.float32)                        # (128, CPAD)
    m_s[...] = m_new

    @pl.when(i == pl.num_programs(0) - 1)
    def _finalize():
        m_ref[...] = m_s[...]
        inv_l = 1.0 / l_s[...]                                     # EXACT reciprocal
        invl_ref[...] = inv_l
        h_agg = acc_s[...] * inv_l                                 # (128, CPAD) = h.T @ det_score
        # cls_net as a VPU multiply + sublane-reduce (skip a tiny MXU matmul)
        cls_logit = jnp.sum(h_agg * wcls_ref[...], axis=0, keepdims=True) + bcls_ref[...]
        cls_logit_ref[...] = cls_logit                             # (1, CPAD)
        y_prob_ref[...] = jax.nn.sigmoid(cls_logit)


def det_score_kernel(p_ref, mtile_ref, m_ref, invl_ref, out_ref):
    # det_score = p * exp(m_tile - m_final) * inv_l  -- one (1,128) exp per tile,
    # the rest is a broadcast multiply (purely memory-bound).
    scale = jnp.exp(mtile_ref[0] - m_ref[...]) * invl_ref[...]     # (1, CPAD)
    out_ref[...] = p_ref[...].astype(jnp.float32) * scale


def init_params(key, fea_dim, n_classes):
    # size_dict['small'] = [fea_dim, 128, 64]; deterministic xavier-uniform init.
    ks = jax.random.split(key, 5)

    def xavier(k, shape):
        fan_in, fan_out = shape
        lim = float(np.sqrt(6.0 / (fan_in + fan_out)))
        return jax.random.uniform(k, shape, jnp.float32, -lim, lim)

    return dict(
        w1=xavier(ks[0], (fea_dim, D_HID)),   b1=jnp.zeros((1, D_HID), jnp.float32),
        wa=xavier(ks[1], (D_HID, D_ATT)),     ba=jnp.zeros((1, D_ATT), jnp.float32),
        wb=xavier(ks[2], (D_HID, D_ATT)),     bb=jnp.zeros((1, D_ATT), jnp.float32),
        wc=xavier(ks[3], (D_ATT, n_classes)), bc=jnp.zeros((1, n_classes), jnp.float32),
        wcls=xavier(ks[4], (D_HID, 1)),       bcls=jnp.zeros((1, 1), jnp.float32),
    )


def _pack_params(params, n_classes):
    # fuse wa|wb, zero-pad the attention head to CPAD columns, cast MXU weights to bf16
    wab = jnp.concatenate([params["wa"], params["wb"]], axis=1).astype(jnp.bfloat16)
    bab = jnp.concatenate([params["ba"], params["bb"]], axis=1).astype(jnp.float32)
    wc_pad = jnp.zeros((D_ATT, CPAD), jnp.bfloat16).at[:, :n_classes].set(
        params["wc"].astype(jnp.bfloat16))
    bc_pad = jnp.zeros((1, CPAD), jnp.float32).at[:, :n_classes].set(params["bc"])
    return (params["w1"].astype(jnp.bfloat16), params["b1"].astype(jnp.float32),
            wab, bab, wc_pad, bc_pad,
            params["wcls"].astype(jnp.float32), params["bcls"].astype(jnp.float32))


def ramil_forward(h, mask, params, n_classes=2, tile_n=1024, return_features=False):
    assert n_classes <= CPAD
    # --- host-side glue: data-dependent mask gather (np.where), like the PyTorch code ---
    f_h, f_w = np.where(mask == 1)
    x = jnp.asarray(h)[:, f_h, f_w].T.astype(jnp.bfloat16)        # (N, fea_dim), bf16 directly
    N, F = x.shape

    # bucket/pad only the tail of the instance axis (aligned tiles, fewer recompiles)
    n_pad = int(pl.cdiv(N, tile_n)) * tile_n
    num_tiles = n_pad // tile_n
    if n_pad != N:
        x = jnp.pad(x, ((0, n_pad - N), (0, 0)))
    n_valid = jnp.array([N], dtype=jnp.int32)

    w1, b1, wab, bab, wc_pad, bc_pad, wcls, bcls = _pack_params(params, n_classes)

    res = lambda i, n: (0, 0)       # weights / stats stay resident
    tile = lambda i, n: (i, 0)      # instance tiles stream through

    out_shapes = [
        jax.ShapeDtypeStruct((n_pad, CPAD), jnp.bfloat16),         # p = exp(logit - m_running)
        jax.ShapeDtypeStruct((num_tiles, 1, CPAD), jnp.float32),   # per-tile m snapshots
        jax.ShapeDtypeStruct((1, CPAD), jnp.float32),              # m_final
        jax.ShapeDtypeStruct((1, CPAD), jnp.float32),              # inv_l (exact)
        jax.ShapeDtypeStruct((1, CPAD), jnp.float32),              # cls_logit (padded)
        jax.ShapeDtypeStruct((1, CPAD), jnp.float32),              # Y_prob (padded)
    ]
    out_specs = [
        pl.BlockSpec((tile_n, CPAD), tile),
        pl.BlockSpec((1, 1, CPAD), lambda i, n: (i, 0, 0)),
        pl.BlockSpec((1, CPAD), res),
        pl.BlockSpec((1, CPAD), res),
        pl.BlockSpec((1, CPAD), res),
        pl.BlockSpec((1, CPAD), res),
    ]
    if return_features:
        out_shapes.append(jax.ShapeDtypeStruct((n_pad, CPAD), jnp.bfloat16))  # det_logit (bf16)
        out_specs.append(pl.BlockSpec((tile_n, CPAD), tile))

    outs = pl.pallas_call(
        partial(_main_kernel, return_features),
        out_shape=tuple(out_shapes),
        grid_spec=pltpu.PrefetchScalarGridSpec(
            num_scalar_prefetch=1,
            grid=(num_tiles,),
            in_specs=[
                pl.BlockSpec((tile_n, F), tile),
                pl.BlockSpec(w1.shape, res),
                pl.BlockSpec(b1.shape, res),
                pl.BlockSpec(wab.shape, res),
                pl.BlockSpec(bab.shape, res),
                pl.BlockSpec(wc_pad.shape, res),
                pl.BlockSpec(bc_pad.shape, res),
                pl.BlockSpec(wcls.shape, res),
                pl.BlockSpec(bcls.shape, res),
            ],
            out_specs=tuple(out_specs),
            scratch_shapes=[
                pltpu.VMEM((1, CPAD), jnp.float32),                # m (running)
                pltpu.VMEM((1, CPAD), jnp.float32),                # l (running)
                pltpu.VMEM((D_HID, CPAD), jnp.float32),            # acc = h.T @ p
            ],
        ),
        compiler_params=pltpu.CompilerParams(
            # online-softmax scratch carries across tiles -> sequential axis
            dimension_semantics=("arbitrary",),
            vmem_limit_bytes=32 * 1024 * 1024,
        ),
    )(n_valid, x, w1, b1, wab, bab, wc_pad, bc_pad, wcls, bcls)

    if return_features:
        p_pad, m_tiles, m_fin, inv_l, cls_pad, y_prob_pad, det_logit_pad = outs
    else:
        p_pad, m_tiles, m_fin, inv_l, cls_pad, y_prob_pad = outs
        det_logit_pad = None

    # pass 2: det_score = p * exp(m_tile - m_final) * inv_l (lane-dense, parallel,
    # blocks matched to pass-1 tiles so each block has a single m snapshot)
    det_score_pad = pl.pallas_call(
        det_score_kernel,
        out_shape=jax.ShapeDtypeStruct((n_pad, CPAD), jnp.float32),
        grid=(num_tiles,),
        in_specs=[
            pl.BlockSpec((tile_n, CPAD), lambda i: (i, 0)),
            pl.BlockSpec((1, 1, CPAD), lambda i: (i, 0, 0)),
            pl.BlockSpec((1, CPAD), lambda i: (0, 0)),
            pl.BlockSpec((1, CPAD), lambda i: (0, 0)),
        ],
        out_specs=pl.BlockSpec((tile_n, CPAD), lambda i: (i, 0)),
        compiler_params=pltpu.CompilerParams(
            dimension_semantics=("parallel",),
            vmem_limit_bytes=32 * 1024 * 1024,
        ),
    )(p_pad, m_tiles, m_fin, inv_l)

    # slice off row / column padding (host-visible shapes match the PyTorch module)
    det_score = det_score_pad[:N, :n_classes]
    cls_logit = cls_pad[:, :n_classes].reshape(n_classes, 1)
    Y_prob = y_prob_pad[0, :n_classes]                             # (n_classes,)
    # torch.topk(Y_prob, 1, dim=0)[1]  ->  argmax index, shape (1,)
    Y_hat = jnp.argmax(Y_prob, axis=0).reshape((1,))

    results_dict = {}
    if return_features:
        results_dict["cls_logits"] = cls_logit
        results_dict["det_logits"] = det_logit_pad[:N, :n_classes].astype(jnp.float32)
    return det_score, [Y_prob], Y_hat, det_score, results_dict


def ramil_reference(x, params):
    # pure-JAX f32 reference of the PyTorch forward (for a sanity check)
    h1 = jnp.maximum(x @ params["w1"] + params["b1"], 0.0)
    a = jnp.tanh(h1 @ params["wa"] + params["ba"])
    b = jax.nn.sigmoid(h1 @ params["wb"] + params["bb"])
    det_logit = (a * b) @ params["wc"] + params["bc"]
    det_score = jax.nn.softmax(det_logit, axis=0)
    h_agg = h1.T @ det_score
    cls_logit = h_agg.T @ params["wcls"] + params["bcls"]
    y_prob = jax.nn.sigmoid(cls_logit)[:, 0]
    return det_score, det_logit, cls_logit, y_prob


if __name__ == "__main__":
    key = jax.random.PRNGKey(0)
    k_h, k_p = jax.random.split(key)

    fea_dim, H, W, n_classes = 32, 16, 16, 2
    h = jax.random.normal(k_h, (fea_dim, H, W), jnp.float32)        # CHW, like PyTorch
    mask = np.zeros((H, W), dtype=np.int32)
    mask[2:14, 2:14] = 1                                            # N = 144 instances

    params = init_params(k_p, fea_dim, n_classes)

    # small tile so the test exercises multi-tile online softmax + row padding
    det_score, y_prob_list, Y_hat, _, results = ramil_forward(
        h, mask, params, n_classes=n_classes, tile_n=128, return_features=True)
    jax.block_until_ready((det_score, y_prob_list[0], Y_hat))

    # sanity check vs. f32 reference (kernel feeds bf16 to the MXU -> loose tols)
    f_h, f_w = np.where(mask == 1)
    x = jnp.asarray(h)[:, f_h, f_w].T.astype(jnp.float32)
    ref_score, ref_logit, ref_cls, ref_prob = ramil_reference(x, params)

    N = int(mask.sum())
    assert det_score.shape == (N, n_classes)
    assert y_prob_list[0].shape == (n_classes,)
    assert Y_hat.shape == (1,)
    np.testing.assert_allclose(np.asarray(results["det_logits"]), np.asarray(ref_logit),
                               rtol=5e-2, atol=2e-2)
    np.testing.assert_allclose(np.asarray(det_score), np.asarray(ref_score),
                               rtol=1e-1, atol=1e-3)
    np.testing.assert_allclose(np.asarray(y_prob_list[0]), np.asarray(ref_prob),
                               rtol=5e-2, atol=1e-2)
    print("KERNEL_OK")
</pallas_src>

<mosaic_0001>
module attributes {stable_mosaic.version = 11 : i64} {
  func.func @_main_kernel(%arg0: i32, %arg1: memref<1xi32, #tpu.memory_space<smem>>, %arg2: memref<128x32xbf16, #tpu.memory_space<vmem>>, %arg3: memref<32x128xbf16, #tpu.memory_space<vmem>>, %arg4: memref<1x128xf32, #tpu.memory_space<vmem>>, %arg5: memref<128x128xbf16, #tpu.memory_space<vmem>>, %arg6: memref<1x128xf32, #tpu.memory_space<vmem>>, %arg7: memref<64x128xbf16, #tpu.memory_space<vmem>>, %arg8: memref<1x128xf32, #tpu.memory_space<vmem>>, %arg9: memref<128x1xf32, #tpu.memory_space<vmem>>, %arg10: memref<1x1xf32, #tpu.memory_space<vmem>>, %arg11: memref<128x128xbf16, #tpu.memory_space<vmem>>, %arg12: memref<1x1x128xf32, #tpu.memory_space<vmem>>, %arg13: memref<1x128xf32, #tpu.memory_space<vmem>>, %arg14: memref<1x128xf32, #tpu.memory_space<vmem>>, %arg15: memref<1x128xf32, #tpu.memory_space<vmem>>, %arg16: memref<1x128xf32, #tpu.memory_space<vmem>>, %arg17: memref<128x128xbf16, #tpu.memory_space<vmem>>, %arg18: memref<1x128xf32, #tpu.memory_space<vmem>>, %arg19: memref<1x128xf32, #tpu.memory_space<vmem>>, %arg20: memref<128x128xf32, #tpu.memory_space<vmem>>) attributes {dimension_semantics = [#tpu.dimension_semantics<arbitrary>], iteration_bounds = array<i64: 2>, scalar_prefetch = 1 : i64, scratch_operands = 3 : i64, tpu.core_type = #tpu.core_type<tc>, window_params = [{transform_indices = @transform_0, window_bounds = array<i64: 128, 32>}, {pipeline_mode = #tpu.pipeline_mode<synchronous>, transform_indices = @transform_1, window_bounds = array<i64: 32, 128>}, {pipeline_mode = #tpu.pipeline_mode<synchronous>, transform_indices = @transform_2, window_bounds = array<i64: 1, 128>}, {pipeline_mode = #tpu.pipeline_mode<synchronous>, transform_indices = @transform_3, window_bounds = array<i64: 128, 128>}, {pipeline_mode = #tpu.pipeline_mode<synchronous>, transform_indices = @transform_4, window_bounds = array<i64: 1, 128>}, {pipeline_mode = #tpu.pipeline_mode<synchronous>, transform_indices = @transform_5, window_bounds = array<i64: 64, 128>}, {pipeline_mode = #tpu.pipeline_mode<synchronous>, transform_indices = @transform_6, window_bounds = array<i64: 1, 128>}, {pipeline_mode = #tpu.pipeline_mode<synchronous>, transform_indices = @transform_7, window_bounds = array<i64: 128, 1>}, {pipeline_mode = #tpu.pipeline_mode<synchronous>, transform_indices = @transform_8, window_bounds = array<i64: 1, 1>}, {transform_indices = @transform_9, window_bounds = array<i64: 128, 128>}, {transform_indices = @transform_10, window_bounds = array<i64: 1, 1, 128>}, {pipeline_mode = #tpu.pipeline_mode<synchronous>, transform_indices = @transform_11, window_bounds = array<i64: 1, 128>}, {pipeline_mode = #tpu.pipeline_mode<synchronous>, transform_indices = @transform_12, window_bounds = array<i64: 1, 128>}, {pipeline_mode = #tpu.pipeline_mode<synchronous>, transform_indices = @transform_13, window_bounds = array<i64: 1, 128>}, {pipeline_mode = #tpu.pipeline_mode<synchronous>, transform_indices = @transform_14, window_bounds = array<i64: 1, 128>}, {transform_indices = @transform_15, window_bounds = array<i64: 128, 128>}]} {
    %c0_i32 = arith.constant 0 : i32
    %0 = arith.cmpi eq, %arg0, %c0_i32 : i32
    %1 = arith.extui %0 : i1 to i32
    %c0_i32_0 = arith.constant 0 : i32
    %2 = arith.cmpi ne, %1, %c0_i32_0 : i32
    scf.if %2 {
      %cst_43 = arith.constant -1.000000e+30 : f32
      %74 = vector.broadcast %cst_43 : f32 to vector<1x128xf32>
      %c0_44 = arith.constant 0 : index
      %c0_45 = arith.constant 0 : index
      %75 = vector.load %arg18[%c0_44, %c0_45] : memref<1x128xf32, #tpu.memory_space<vmem>>, vector<1x128xf32>
      tpu.vector_store %arg18[%c0_44, %c0_45], %74 {strides = array<i32>} : memref<1x128xf32, #tpu.memory_space<vmem>>, vector<1x128xf32>,
      %cst_46 = arith.constant 0.000000e+00 : f32
      %76 = vector.broadcast %cst_46 : f32 to vector<1x128xf32>
      %c0_47 = arith.constant 0 : index
      %c0_48 = arith.constant 0 : index
      %77 = vector.load %arg19[%c0_47, %c0_48] : memref<1x128xf32, #tpu.memory_space<vmem>>, vector<1x128xf32>
      tpu.vector_store %arg19[%c0_47, %c0_48], %76 {strides = array<i32>} : memref<1x128xf32, #tpu.memory_space<vmem>>, vector<1x128xf32>,
      %cst_49 = arith.constant 0.000000e+00 : f32
      %78 = vector.broadcast %cst_49 : f32 to vector<128x128xf32>
      %c0_50 = arith.constant 0 : index
      %c0_51 = arith.constant 0 : index
      %79 = vector.load %arg20[%c0_50, %c0_51] : memref<128x128xf32, #tpu.memory_space<vmem>>, vector<128x128xf32>
      tpu.vector_store %arg20[%c0_50, %c0_51], %78 {strides = array<i32>} : memref<128x128xf32, #tpu.memory_space<vmem>>, vector<128x128xf32>,
    } else {
    }
    %c0 = arith.constant 0 : index
    %c0_1 = arith.constant 0 : index
    %3 = vector.load %arg2[%c0, %c0_1] : memref<128x32xbf16, #tpu.memory_space<vmem>>, vector<128x32xbf16>
    %c0_2 = arith.constant 0 : index
    %c0_3 = arith.constant 0 : index
    %4 = vector.load %arg3[%c0_2, %c0_3] : memref<32x128xbf16, #tpu.memory_space<vmem>>, vector<32x128xbf16>
    %cst = arith.constant dense<0.000000e+00> : vector<128x128xf32>
    %5 = tpu.matmul %3, %4, %cst {dimension_numbers = #tpu.dot_dimension_numbers<[1], [0], [0], [1], [0, 0, 1, 1], [], []>} : vector<128x32xbf16>, vector<32x128xbf16>, vector<128x128xf32> -> vector<128x128xf32>
    %c0_4 = arith.constant 0 : index
    %c0_5 = arith.constant 0 : index
    %6 = vector.load %arg4[%c0_4, %c0_5] : memref<1x128xf32, #tpu.memory_space<vmem>>, vector<1x128xf32>
    %7 = vector.broadcast %6 : vector<1x128xf32> to vector<128x128xf32>
    %8 = arith.addf %5, %7 : vector<128x128xf32>
    %cst_6 = arith.constant 0.000000e+00 : f32
    %9 = vector.broadcast %cst_6 : f32 to vector<128x128xf32>
    %10 = arith.maximumf %8, %9 : vector<128x128xf32>
    %11 = arith.truncf %10 : vector<128x128xf32> to vector<128x128xbf16>
    %c0_7 = arith.constant 0 : index
    %c0_8 = arith.constant 0 : index
    %12 = vector.load %arg5[%c0_7, %c0_8] : memref<128x128xbf16, #tpu.memory_space<vmem>>, vector<128x128xbf16>
    %cst_9 = arith.constant dense<0.000000e+00> : vector<128x128xf32>
    %13 = tpu.matmul %11, %12, %cst_9 {dimension_numbers = #tpu.dot_dimension_numbers<[1], [0], [0], [1], [0, 0, 1, 1], [], []>} : vector<128x128xbf16>, vector<128x128xbf16>, vector<128x128xf32> -> vector<128x128xf32>
    %c0_10 = arith.constant 0 : index
    %c0_11 = arith.constant 0 : index
    %14 = vector.load %arg6[%c0_10, %c0_11] : memref<1x128xf32, #tpu.memory_space<vmem>>, vector<1x128xf32>
    %15 = vector.broadcast %14 : vector<1x128xf32> to vector<128x128xf32>
    %16 = arith.addf %13, %15 : vector<128x128xf32>
    %17 = vector.extract_strided_slice %16 {offsets = [0, 0], sizes = [128, 64], strides = [1, 1]} : vector<128x128xf32> to vector<128x64xf32>
    %18 = math.tanh %17 : vector<128x64xf32>
    %19 = vector.extract_strided_slice %16 {offsets = [0, 64], sizes = [128, 64], strides = [1, 1]} : vector<128x128xf32> to vector<128x64xf32>
    %20 = arith.negf %19 : vector<128x64xf32>
    %21 = math.exp %20 : vector<128x64xf32>
    %cst_12 = arith.constant 1.000000e+00 : f32
    %22 = vector.broadcast %cst_12 : f32 to vector<128x64xf32>
    %23 = arith.addf %22, %21 : vector<128x64xf32>
    %24 = arith.divf %22, %23 : vector<128x64xf32>
    %25 = arith.mulf %18, %24 : vector<128x64xf32>
    %26 = arith.truncf %25 : vector<128x64xf32> to vector<128x64xbf16>
    %c0_13 = arith.constant 0 : index
    %c0_14 = arith.constant 0 : index
    %27 = vector.load %arg7[%c0_13, %c0_14] : memref<64x128xbf16, #tpu.memory_space<vmem>>, vector<64x128xbf16>
    %cst_15 = arith.constant dense<0.000000e+00> : vector<128x128xf32>
    %28 = tpu.matmul %26, %27, %cst_15 {dimension_numbers = #tpu.dot_dimension_numbers<[1], [0], [0], [1], [0, 0, 1, 1], [], []>} : vector<128x64xbf16>, vector<64x128xbf16>, vector<128x128xf32> -> vector<128x128xf32>
    %c0_16 = arith.constant 0 : index
    %c0_17 = arith.constant 0 : index
    %29 = vector.load %arg8[%c0_16, %c0_17] : memref<1x128xf32, #tpu.memory_space<vmem>>, vector<1x128xf32>
    %30 = vector.broadcast %29 : vector<1x128xf32> to vector<128x128xf32>
    %31 = arith.addf %28, %30 : vector<128x128xf32>
    %32 = arith.truncf %31 : vector<128x128xf32> to vector<128x128xbf16>
    %c0_18 = arith.constant 0 : index
    %c0_19 = arith.constant 0 : index
    %33 = vector.load %arg17[%c0_18, %c0_19] : memref<128x128xbf16, #tpu.memory_space<vmem>>, vector<128x128xbf16>
    tpu.vector_store %arg17[%c0_18, %c0_19], %32 {strides = array<i32>} : memref<128x128xbf16, #tpu.memory_space<vmem>>, vector<128x128xbf16>,
    %c0_20 = arith.constant 0 : index
    %34 = memref.load %arg1[%c0_20] : memref<1xi32, #tpu.memory_space<smem>>
    %c128_i32 = arith.constant 128 : i32
    %35 = arith.muli %arg0, %c128_i32 : i32
    %36 = tpu.iota {dimensions = array<i32: 0>} : vector<128x1xi32>
    %37 = vector.broadcast %35 : i32 to vector<128x1xi32>
    %38 = arith.addi %37, %36 : vector<128x1xi32>
    %39 = vector.broadcast %34 : i32 to vector<128x1xi32>
    %40 = arith.cmpi slt, %38, %39 : vector<128x1xi32>
    %cst_21 = arith.constant -1.000000e+30 : f32
    %41 = vector.shape_cast %40 : vector<128x1xi1> to vector<128x1xi1>
    %42 = vector.broadcast %41 : vector<128x1xi1> to vector<128x128xi1>
    %43 = vector.broadcast %cst_21 : f32 to vector<128x128xf32>
    %44 = arith.select %42, %31, %43 : vector<128x128xi1>, vector<128x128xf32>
    %c0_22 = arith.constant 0 : index
    %c0_23 = arith.constant 0 : index
    %45 = vector.load %arg18[%c0_22, %c0_23] : memref<1x128xf32, #tpu.memory_space<vmem>>, vector<1x128xf32>
    %cst_24 = arith.constant dense<0xFF800000> : vector<128xf32>
    %46 = vector.multi_reduction <maximumf>, %44, %cst_24 [0] : vector<128x128xf32> to vector<128xf32>
    %47 = vector.shape_cast %46 : vector<128xf32> to vector<1x128xf32>
    %48 = arith.maximumf %45, %47 : vector<1x128xf32>
    %49 = arith.subf %45, %48 : vector<1x128xf32>
    %50 = math.exp %49 : vector<1x128xf32>
    %51 = vector.broadcast %48 : vector<1x128xf32> to vector<128x128xf32>
    %52 = arith.subf %44, %51 : vector<128x128xf32>
    %53 = math.exp %52 : vector<128x128xf32>
    %54 = arith.truncf %53 : vector<128x128xf32> to vector<128x128xbf16>
    %c0_25 = arith.constant 0 : index
    %c0_26 = arith.constant 0 : index
    %55 = vector.load %arg11[%c0_25, %c0_26] : memref<128x128xbf16, #tpu.memory_space<vmem>>, vector<128x128xbf16>
    tpu.vector_store %arg11[%c0_25, %c0_26], %54 {strides = array<i32>} : memref<128x128xbf16, #tpu.memory_space<vmem>>, vector<128x128xbf16>,
    %56 = vector.shape_cast %48 : vector<1x128xf32> to vector<1x1x128xf32>
    %c0_27 = arith.constant 0 : index
    %c0_28 = arith.constant 0 : index
    %c0_29 = arith.constant 0 : index
    %57 = vector.load %arg12[%c0_27, %c0_28, %c0_29] : memref<1x1x128xf32, #tpu.memory_space<vmem>>, vector<1x1x128xf32>
    tpu.vector_store %arg12[%c0_27, %c0_28, %c0_29], %56 {strides = array<i32>} : memref<1x1x128xf32, #tpu.memory_space<vmem>>, vector<1x1x128xf32>,
    %c0_30 = arith.constant 0 : index
    %c0_31 = arith.constant 0 : index
    %58 = vector.load %arg19[%c0_30, %c0_31] : memref<1x128xf32, #tpu.memory_space<vmem>>, vector<1x128xf32>
    %59 = arith.mulf %50, %58 : vector<1x128xf32>
    %cst_32 = arith.constant dense<0.000000e+00> : vector<128xf32>
    %60 = vector.multi_reduction <add>, %53, %cst_32 [0] : vector<128x128xf32> to vector<128xf32>
    %61 = vector.shape_cast %60 : vector<128xf32> to vector<1x128xf32>
    %62 = arith.addf %59, %61 : vector<1x128xf32>
    %c0_33 = arith.constant 0 : index
    %c0_34 = arith.constant 0 : index
    %63 = vector.load %arg19[%c0_33, %c0_34] : memref<1x128xf32, #tpu.memory_space<vmem>>, vector<1x128xf32>
    tpu.vector_store %arg19[%c0_33, %c0_34], %62 {strides = array<i32>} : memref<1x128xf32, #tpu.memory_space<vmem>>, vector<1x128xf32>,
    %c0_35 = arith.constant 0 : index
    %c0_36 = arith.constant 0 : index
    %64 = vector.load %arg20[%c0_35, %c0_36] : memref<128x128xf32, #tpu.memory_space<vmem>>, vector<128x128xf32>
    %65 = vector.broadcast %50 : vector<1x128xf32> to vector<128x128xf32>
    %66 = arith.mulf %65, %64 : vector<128x128xf32>
    %cst_37 = arith.constant dense<0.000000e+00> : vector<128x128xf32>
    %67 = tpu.matmul %11, %54, %cst_37 {dimension_numbers = #tpu.dot_dimension_numbers<[0], [0], [1], [1], [0, 1, 1, 1], [], []>} : vector<128x128xbf16>, vector<128x128xbf16>, vector<128x128xf32> -> vector<128x128xf32>
    %68 = arith.addf %66, %67 : vector<128x128xf32>
    %c0_38 = arith.constant 0 : index
    %c0_39 = arith.constant 0 : index
    %69 = vector.load %arg20[%c0_38, %c0_39] : memref<128x128xf32, #tpu.memory_space<vmem>>, vector<128x128xf32>
    tpu.vector_store %arg20[%c0_38, %c0_39], %68 {strides = array<i32>} : memref<128x128xf32, #tpu.memory_space<vmem>>, vector<128x128xf32>,
    %c0_40 = arith.constant 0 : index
    %c0_41 = arith.constant 0 : index
    %70 = vector.load %arg18[%c0_40, %c0_41] : memref<1x128xf32, #tpu.memory_space<vmem>>, vector<1x128xf32>
    tpu.vector_store %arg18[%c0_40, %c0_41], %48 {strides = array<i32>} : memref<1x128xf32, #tpu.memory_space<vmem>>, vector<1x128xf32>,
    %c1_i32 = arith.constant 1 : i32
    %71 = arith.cmpi eq, %arg0, %c1_i32 : i32
    %72 = arith.extui %71 : i1 to i32
    %c0_i32_42 = arith.constant 0 : i32
    %73 = arith.cmpi ne, %72, %c0_i32_42 : i32
    scf.if %73 {
      %c0_43 = arith.constant 0 : index
      %c0_44 = arith.constant 0 : index
      %74 = vector.load %arg18[%c0_43, %c0_44] : memref<1x128xf32, #tpu.memory_space<vmem>>, vector<1x128xf32>
      %c0_45 = arith.constant 0 : index
      %c0_46 = arith.constant 0 : index
      %75 = vector.load %arg13[%c0_45, %c0_46] : memref<1x128xf32, #tpu.memory_space<vmem>>, vector<1x128xf32>
      tpu.vector_store %arg13[%c0_45, %c0_46], %74 {strides = array<i32>} : memref<1x128xf32, #tpu.memory_space<vmem>>, vector<1x128xf32>,
      %c0_47 = arith.constant 0 : index
      %c0_48 = arith.constant 0 : index
      %76 = vector.load %arg19[%c0_47, %c0_48] : memref<1x128xf32, #tpu.memory_space<vmem>>, vector<1x128xf32>
      %cst_49 = arith.constant 1.000000e+00 : f32
      %77 = vector.broadcast %cst_49 : f32 to vector<1x128xf32>
      %78 = arith.divf %77, %76 : vector<1x128xf32>
      %c0_50 = arith.constant 0 : index
      %c0_51 = arith.constant 0 : index
      %79 = vector.load %arg14[%c0_50, %c0_51] : memref<1x128xf32, #tpu.memory_space<vmem>>, vector<1x128xf32>
      tpu.vector_store %arg14[%c0_50, %c0_51], %78 {strides = array<i32>} : memref<1x128xf32, #tpu.memory_space<vmem>>, vector<1x128xf32>,
      %c0_52 = arith.constant 0 : index
      %c0_53 = arith.constant 0 : index
      %80 = vector.load %arg20[%c0_52, %c0_53] : memref<128x128xf32, #tpu.memory_space<vmem>>, vector<128x128xf32>
      %81 = vector.broadcast %78 : vector<1x128xf32> to vector<128x128xf32>
      %82 = arith.mulf %80, %81 : vector<128x128xf32>
      %c0_54 = arith.constant 0 : index
      %c0_55 = arith.constant 0 : index
      %83 = vector.load %arg9[%c0_54, %c0_55] : memref<128x1xf32, #tpu.memory_space<vmem>>, vector<128x1xf32>
      %84 = vector.broadcast %83 : vector<128x1xf32> to vector<128x128xf32>
      %85 = arith.mulf %82, %84 : vector<128x128xf32>
      %cst_56 = arith.constant dense<0.000000e+00> : vector<128xf32>
      %86 = vector.multi_reduction <add>, %85, %cst_56 [0] : vector<128x128xf32> to vector<128xf32>
      %87 = vector.shape_cast %86 : vector<128xf32> to vector<1x128xf32>
      %c0_57 = arith.constant 0 : index
      %c0_58 = arith.constant 0 : index
      %88 = vector.load %arg10[%c0_57, %c0_58] : memref<1x1xf32, #tpu.memory_space<vmem>>, vector<1x1xf32>
      %89 = vector.broadcast %88 : vector<1x1xf32> to vector<1x128xf32>
      %90 = arith.addf %87, %89 : vector<1x128xf32>
      %c0_59 = arith.constant 0 : index
      %c0_60 = arith.constant 0 : index
      %91 = vector.load %arg15[%c0_59, %c0_60] : memref<1x128xf32, #tpu.memory_space<vmem>>, vector<1x128xf32>
      tpu.vector_store %arg15[%c0_59, %c0_60], %90 {strides = array<i32>} : memref<1x128xf32, #tpu.memory_space<vmem>>, vector<1x128xf32>,
      %92 = arith.negf %90 : vector<1x128xf32>
      %93 = math.exp %92 : vector<1x128xf32>
      %cst_61 = arith.constant 1.000000e+00 : f32
      %94 = vector.broadcast %cst_61 : f32 to vector<1x128xf32>
      %95 = arith.addf %94, %93 : vector<1x128xf32>
      %96 = arith.divf %94, %95 : vector<1x128xf32>
      %c0_62 = arith.constant 0 : index
      %c0_63 = arith.constant 0 : index
      %97 = vector.load %arg16[%c0_62, %c0_63] : memref<1x128xf32, #tpu.memory_space<vmem>>, vector<1x128xf32>
      tpu.vector_store %arg16[%c0_62, %c0_63], %96 {strides = array<i32>} : memref<1x128xf32, #tpu.memory_space<vmem>>, vector<1x128xf32>,
    } else {
    }
    return
  }
  func.func @transform_0(%arg0: i32, %arg1: memref<1xi32, #tpu.memory_space<smem>>) -> (i32, i32) {
    %c0_i32 = arith.constant 0 : i32
    %c0_i32_0 = arith.constant 0 : i32
    return %arg0, %c0_i32 : i32, i32
  }
  func.func @transform_1(%arg0: i32, %arg1: memref<1xi32, #tpu.memory_space<smem>>) -> (i32, i32) {
    %c0_i32 = arith.constant 0 : i32
    %c0_i32_0 = arith.constant 0 : i32
    %c0_i32_1 = arith.constant 0 : i32
    return %c0_i32, %c0_i32_0 : i32, i32
  }
  func.func @transform_2(%arg0: i32, %arg1: memref<1xi32, #tpu.memory_space<smem>>) -> (i32, i32) {
    %c0_i32 = arith.constant 0 : i32
    %c0_i32_0 = arith.constant 0 : i32
    %c0_i32_1 = arith.constant 0 : i32
    return %c0_i32, %c0_i32_0 : i32, i32
  }
  func.func @transform_3(%arg0: i32, %arg1: memref<1xi32, #tpu.memory_space<smem>>) -> (i32, i32) {
    %c0_i32 = arith.constant 0 : i32
    %c0_i32_0 = arith.constant 0 : i32
    %c0_i32_1 = arith.constant 0 : i32
    return %c0_i32, %c0_i32_0 : i32, i32
  }
  func.func @transform_4(%arg0: i32, %arg1: memref<1xi32, #tpu.memory_space<smem>>) -> (i32, i32) {
    %c0_i32 = arith.constant 0 : i32
    %c0_i32_0 = arith.constant 0 : i32
    %c0_i32_1 = arith.constant 0 : i32
    return %c0_i32, %c0_i32_0 : i32, i32
  }
  func.func @transform_5(%arg0: i32, %arg1: memref<1xi32, #tpu.memory_space<smem>>) -> (i32, i32) {
    %c0_i32 = arith.constant 0 : i32
    %c0_i32_0 = arith.constant 0 : i32
    %c0_i32_1 = arith.constant 0 : i32
    return %c0_i32, %c0_i32_0 : i32, i32
  }
  func.func @transform_6(%arg0: i32, %arg1: memref<1xi32, #tpu.memory_space<smem>>) -> (i32, i32) {
    %c0_i32 = arith.constant 0 : i32
    %c0_i32_0 = arith.constant 0 : i32
    %c0_i32_1 = arith.constant 0 : i32
    return %c0_i32, %c0_i32_0 : i32, i32
  }
  func.func @transform_7(%arg0: i32, %arg1: memref<1xi32, #tpu.memory_space<smem>>) -> (i32, i32) {
    %c0_i32 = arith.constant 0 : i32
    %c0_i32_0 = arith.constant 0 : i32
    %c0_i32_1 = arith.constant 0 : i32
    return %c0_i32, %c0_i32_0 : i32, i32
  }
  func.func @transform_8(%arg0: i32, %arg1: memref<1xi32, #tpu.memory_space<smem>>) -> (i32, i32) {
    %c0_i32 = arith.constant 0 : i32
    %c0_i32_0 = arith.constant 0 : i32
    %c0_i32_1 = arith.constant 0 : i32
    return %c0_i32, %c0_i32_0 : i32, i32
  }
  func.func @transform_9(%arg0: i32, %arg1: memref<1xi32, #tpu.memory_space<smem>>) -> (i32, i32) {
    %c0_i32 = arith.constant 0 : i32
    %c0_i32_0 = arith.constant 0 : i32
    return %arg0, %c0_i32 : i32, i32
  }
  func.func @transform_10(%arg0: i32, %arg1: memref<1xi32, #tpu.memory_space<smem>>) -> (i32, i32, i32) {
    %c0_i32 = arith.constant 0 : i32
    %c0_i32_0 = arith.constant 0 : i32
    %c0_i32_1 = arith.constant 0 : i32
    return %arg0, %c0_i32, %c0_i32_0 : i32, i32, i32
  }
  func.func @transform_11(%arg0: i32, %arg1: memref<1xi32, #tpu.memory_space<smem>>) -> (i32, i32) {
    %c0_i32 = arith.constant 0 : i32
    %c0_i32_0 = arith.constant 0 : i32
    %c0_i32_1 = arith.constant 0 : i32
    return %c0_i32, %c0_i32_0 : i32, i32
  }
  func.func @transform_12(%arg0: i32, %arg1: memref<1xi32, #tpu.memory_space<smem>>) -> (i32, i32) {
    %c0_i32 = arith.constant 0 : i32
    %c0_i32_0 = arith.constant 0 : i32
    %c0_i32_1 = arith.constant 0 : i32
    return %c0_i32, %c0_i32_0 : i32, i32
  }
  func.func @transform_13(%arg0: i32, %arg1: memref<1xi32, #tpu.memory_space<smem>>) -> (i32, i32) {
    %c0_i32 = arith.constant 0 : i32
    %c0_i32_0 = arith.constant 0 : i32
    %c0_i32_1 = arith.constant 0 : i32
    return %c0_i32, %c0_i32_0 : i32, i32
  }
  func.func @transform_14(%arg0: i32, %arg1: memref<1xi32, #tpu.memory_space<smem>>) -> (i32, i32) {
    %c0_i32 = arith.constant 0 : i32
    %c0_i32_0 = arith.constant 0 : i32
    %c0_i32_1 = arith.constant 0 : i32
    return %c0_i32, %c0_i32_0 : i32, i32
  }
  func.func @transform_15(%arg0: i32, %arg1: memref<1xi32, #tpu.memory_space<smem>>) -> (i32, i32) {
    %c0_i32 = arith.constant 0 : i32
    %c0_i32_0 = arith.constant 0 : i32
    return %arg0, %c0_i32 : i32, i32
  }
}

</mosaic_0001>

<bundles_post_ra>
// kernel: tpu_custom_call.1
= control target key start
LH: loop header
LB: loop body
LE: loop exit
PB: predicated region body
PF: predicated region fallthrough
CT: control target
= control target key end

     0   :  { %s4046_s0 = inlined_call_operand.<no memory space> [shape: s32[1], index: 0, kind: input, shape index: {}]   ;;  %s4047_s1 = inlined_call_operand.vmem [shape: bf16[256,32], index: 1, kind: input, shape index: {}]   ;;  %s4048_s2 = inlined_call_operand.vmem [shape: bf16[32,128], index: 2, kind: input, shape index: {}]   ;;  %s4049_s3 = inlined_call_operand.vmem [shape: f32[1,128], index: 3, kind: input, shape index: {}]   ;;  %s4050_s4 = inlined_call_operand.vmem [shape: bf16[128,128], index: 4, kind: input, shape index: {}]   ;;  %s4051_s5 = inlined_call_operand.vmem [shape: f32[1,128], index: 5, kind: input, shape index: {}]   ;;  %s4052_s6 = inlined_call_operand.vmem [shape: bf16[64,128], index: 6, kind: input, shape index: {}]   ;;  %s4053_s7 = inlined_call_operand.vmem [shape: f32[1,128], index: 7, kind: input, shape index: {}]   ;;  %s4054_s8 = inlined_call_operand.vmem [shape: f32[128,1], index: 8, kind: input, shape index: {}]   ;;  %s4055_s9 = inlined_call_operand.<no memory space> [shape: f32[1,1], index: 9, kind: input, shape index: {}]   ;;  %s4056_s10 = inlined_call_operand.hbm [shape: bf16[256,128], index: 10, kind: output, shape index: {0}]   ;;  %s4057_s11 = inlined_call_operand.hbm [shape: f32[2,1,128], index: 11, kind: output, shape index: {1}]   ;;  %s4058_s12 = inlined_call_operand.hbm [shape: f32[1,128], index: 12, kind: output, shape index: {2}]   ;;  %s4059_s13 = inlined_call_operand.hbm [shape: f32[1,128], index: 13, kind: output, shape index: {3}]   ;;  %s4060_s14 = inlined_call_operand.hbm [shape: f32[1,128], index: 14, kind: output, shape index: {4}]   ;;  %s4061_s15 = inlined_call_operand.hbm [shape: f32[1,128], index: 15, kind: output, shape index: {5}]   ;;  %s4062_s16 = inlined_call_operand.hbm [shape: bf16[256,128], index: 16, kind: output, shape index: {6}]  }
   0x1   :  { %4070 = sst [smem:[#allocation28_spill]] %s4046_s0  ;;  %v23_v0 = vstv %s4055_s9 }
   0x2   :  { %4071 = sst [smem:[#allocation29_spill]] %s4047_s1  ;;  %s4078_s23 = sld [smem:[#allocation28_spill]]  ;;  %24 = vst [vmem:[#allocation7] sm:$0x1] %v23_v0 }
   0x3   :  { %4072 = sst [smem:[#allocation30_spill]] %s4048_s2 }
   0x4   :  { %4073 = sst [smem:[#allocation31_spill]] %s4049_s3 }
   0x5   :  { %4074 = sst [smem:[#allocation32_spill]] %s4050_s4 }
   0x6   :  { %4075 = sst [smem:[#allocation33_spill]] %s4051_s5 }
   0x7   :  { %4076 = sst [smem:[#allocation34_spill]] %s4052_s6 }
   0x8   :  { %4077 = sst [smem:[#allocation35_spill]] %s4053_s7 }
   0x9   :  { %22 = sst [smem:[#allocation6]] %s4078_s23 }
   0xa   :  { %25 = vsyncpa [#allocation9], 0 }
   0xb   :  { %27 = vsyncpa [#allocation9 + $0x1], 0 }
   0xc   :  { %28 = vsyncpa [#allocation11], 0 }
   0xd   :  { %30 = vsyncpa [#allocation11 + $0x1], 0 }
   0xe   :  { %31 = vsyncpa [#allocation14], 0 }
   0xf   :  { %32 = vsyncpa [#allocation17], 0  ;;  %s3306_s26 = smov 0   ;;  %s3308_s27 = smov 0  }
  0x10   :  { %s3310_s28 = smov 0   ;;  %s3312_s29 = smov 0  }
  0x11 LB: > { %4079 = sst [smem:[#allocation25_spill]] %s3197_s28  ;;  %s3325_s9 = sadd.s32 4294967295, %s3201_s29   ;;  %s3201_s29 = sphi %s3312_s29, %s4094_s29   ;;  %s3197_s28 = sphi %s3310_s28, %s4096_s28   ;;  %s3193_s27 = sphi %s3308_s27, %s4098_s27   ;;  %s3189_s26 = sphi %s3306_s26, %s4097_s26  }
  0x12   : > { %s4063_s30 = sadd.s32 4294967294, %s3201_s29   ;;  %s3329_s0 = sadd.s32 1, %s3201_s29  }
  0x13   : > { %4080 = sst [smem:[#allocation26_spill]] %s3329_s0  ;;  %s239_s17 = sadd.s32 1, %s3197_s28 }
  0x14   : > { %s236_s18 = ssub.s32 %s3201_s29, %s3329_s0  ;;  %p249_p0 = scmp.ne.s32.totalorder %s3197_s28, %s3193_s27 }
  0x15   : > { %p237_p1 = scmp.eq.s32.totalorder %s236_s18, 0  ;;  %p250_p2 = scmp.eq.s32.totalorder %s3325_s9, 1 }
  0x16   : > { %p255_p3 = scmp.ne.s32.totalorder %s3193_s27, %s3189_s26  ;;  %p256_p4 = scmp.eq.s32.totalorder %s4063_s30, 1 }
  0x17   : > { %s3341_s19 = scalar_select %p237_p1, %s3197_s28, %s239_s17  }
  0x18   : > { %p3345_p5 = por %p250_p2, %p249_p0  ;;  %p3349_p6 = por %p256_p4, %p255_p3 }
  0x19   : > { %4081 = sst [smem:[#allocation27_spill]] %s3341_s19  ;;  %p2296_p7 = scmp.ge.s32.totalorder %s3201_s29, 1 }
  0x1a   : > { %p443_p8 = scmp.lt.s32.totalorder %s3201_s29, 3 }
  0x1c   : > { %p444_p9 = pnand %p2296_p7, %p443_p8 }
  0x1d   : > { %s476_s22 = sand.u32 (!%p444_p9), 1, %s3193_s27   ;;  %s3357_s23 = sshll.u32 (!%p444_p9), %s3325_s9, 4 }
  0x1e   : > { %447 = sbr.rel (%p444_p9) target bundleno = 1552 (0x610), region = 56  ;;  %s2297_s24 = sshll.u32 (!%p444_p9), %s476_s22, 6 }
  0x1f   : > { %p501_p10 = scmp.lt.s32.totalorder (!%p444_p9), %s3357_s23, 31  ;;  %s4084_s1 = sld [smem:[#allocation29_spill]] (!%p444_p9) }
  0x20   : > { %s3366_s19 = scalar_lea.vmem (!%p444_p9), [#allocation8], %s2297_s24  ;;  %s3368_s28 = scalar_lea.vmem (!%p444_p9), [#allocation10], %s476_s22 }
  0x21   : > { %s3370_s0 = scalar_lea.vmem (!%p444_p9), [#allocation18], %s2297_s24  ;;  %p2301_p11 = scmp.ne.s32.totalorder (!%p444_p9), %s3325_s9, 0 }
  0x25   : > { %s502_s25 = scalar_select %p501_p10, %s3357_s23, 31 }
  0x26   : > { %512 = sbr.rel (%p2301_p11) target bundleno = 48 (0x30), region = 60  ;;  %v3203_v1 = vmov (!%p2301_p11), -1e+30   ;;  %v3204_v2 = vmov (!%p2301_p11), 0.0  }
  0x27   : > { %s2300_s26 = sshll.u32 %s502_s25, 2  ;;  %513 = vst [vmem:[#allocation2] sm:$0x1] (!%p2301_p11), %v3203_v1  ;;  %514 = vst [vmem:[#allocation3] sm:$0x1] (!%p2301_p11), %v3204_v2 }
  0x28   : > { %s3364_s30 = scalar_lea.vmem %s4084_s1, %s2300_s26  ;;  %515 = vst [vmem:[#allocation4] sm:$0xff] (!%p2301_p11), %v3204_v2  ;;  %516 = vst [vmem:[#allocation4 + $0x8] sm:$0xff] (!%p2301_p11), %v3204_v2 }
  0x29   : > { %517 = vst [vmem:[#allocation4 + $0x10] sm:$0xff] (!%p2301_p11), %v3204_v2  ;;  %518 = vst [vmem:[#allocation4 + $0x18] sm:$0xff] (!%p2301_p11), %v3204_v2 }
  0x2a   : > { %519 = vst [vmem:[#allocation4 + $0x20] sm:$0xff] (!%p2301_p11), %v3204_v2  ;;  %520 = vst [vmem:[#allocation4 + $0x28] sm:$0xff] (!%p2301_p11), %v3204_v2 }
  0x2b   : > { %521 = vst [vmem:[#allocation4 + $0x30] sm:$0xff] (!%p2301_p11), %v3204_v2  ;;  %522 = vst [vmem:[#allocation4 + $0x38] sm:$0xff] (!%p2301_p11), %v3204_v2 }
  0x2c   : > { %523 = vst [vmem:[#allocation4 + $0x40] sm:$0xff] (!%p2301_p11), %v3204_v2  ;;  %524 = vst [vmem:[#allocation4 + $0x48] sm:$0xff] (!%p2301_p11), %v3204_v2 }
  0x2d   : > { %525 = vst [vmem:[#allocation4 + $0x50] sm:$0xff] %v3204_v2  ;;  %526 = vst [vmem:[#allocation4 + $0x58] sm:$0xff] %v3204_v2 }
  0x2e   : > { %527 = vst [vmem:[#allocation4 + $0x60] sm:$0xff] %v3204_v2  ;;  %528 = vst [vmem:[#allocation4 + $0x68] sm:$0xff] %v3204_v2 }
  0x2f   : > { %529 = vst [vmem:[#allocation4 + $0x70] sm:$0xff] %v3204_v2  ;;  %530 = vst [vmem:[#allocation4 + $0x78] sm:$0xff] %v3204_v2 }
  0x30 PF: > { %s4085_s2 = sld [smem:[#allocation30_spill]]  ;;  %vm610_vm0 = vcmask 261120   ;;  %v2801_v5 = vld [vmem:[%s3364_s30] sm:$0xff]   ;;  %v2802_v6 = vld [vmem:[%s3364_s30 + $0x8] sm:$0xff]   ;;  %v2803_v7 = vld [vmem:[%s3364_s30 + $0x10] sm:$0xff]   ;;  %s4086_s4 = sld [smem:[#allocation32_spill]] }
  0x31   : > { %2597 = vmatprep.mubr.msk.bf16.mxu0 %vm610_vm0, %v2801_v5  ;;  %v2804_v10 = vld [vmem:[%s3364_s30 + $0x18] sm:$0xff]   ;;  %v2805_v12 = vld [vmem:[%s3364_s30 + $0x20] sm:$0xff]   ;;  %v2806_v14 = vld [vmem:[%s3364_s30 + $0x28] sm:$0xff]   ;;  %s4087_s3 = sld [smem:[#allocation31_spill]]  ;;  %s4088_s6 = sld [smem:[#allocation34_spill]]  ;;  %vm1163_vm1 = vcmask 523264  }
  0x32   : > { %v2807_v16 = vld [vmem:[%s3364_s30 + $0x30] sm:$0xff]   ;;  %v2808_v18 = vld [vmem:[%s3364_s30 + $0x38] sm:$0xff]   ;;  %s4089_s5 = sld [smem:[#allocation33_spill]]  ;;  %s4067_s25 = smov 64  }
  0x33   : > { %s4090_s7 = sld [smem:[#allocation35_spill]]  ;;  %s1365_s18 = sld [smem:[#allocation6]] }
  0x34   : > { %s2375_s22 = sshll.u32 %s3325_s9, 7  ;;  %p2392_p12 = scmp.ne.s32.totalorder %s3325_s9, 1 }
  0x36   : > { %v2799_v3 = vld [vmem:[%s4085_s2] sm:$0xff]   ;;  %v2800_v4 = vld [vmem:[%s4085_s2 + $0x8] sm:$0xff]   ;;  %v2811_v11 = vld [vmem:[%s4086_s4 + $0x10] sm:$0xff]  }
  0x37   : > { %2593 = vmatprep.subr.bf16.mxu0 %v2799_v3  ;;  %v2809_v8 = vld [vmem:[%s4086_s4] sm:$0xff]   ;;  %v2810_v9 = vld [vmem:[%s4086_s4 + $0x8] sm:$0xff]   ;;  %v2812_v13 = vld [vmem:[%s4086_s4 + $0x18] sm:$0xff]  }
  0x38   : > { %2594 = vmatpush3.bf16.msra.mxu0 %v2799_v3  ;;  %2613 = vmatprep.subr.bf16.mxu1 %v2809_v8  ;;  %v2813_v15 = vld [vmem:[%s4086_s4 + $0x20] sm:$0xff]   ;;  %v2814_v17 = vld [vmem:[%s4086_s4 + $0x28] sm:$0xff]   ;;  %v2815_v19 = vld [vmem:[%s4086_s4 + $0x30] sm:$0xff]  }
  0x39   : > { %2595 = vmatprep.subr.bf16.mxu0 %v2800_v4  ;;  %2614 = vmatpush3.bf16.msra.mxu1 %v2809_v8  ;;  %v2816_v20 = vld [vmem:[%s4086_s4 + $0x38] sm:$0xff]   ;;  %v2302_v21 = vld [vmem:[%s4087_s3] ss:$0 sm:$0xff] }
  0x3a   : > { %2615 = vmatprep.subr.bf16.mxu1 %v2810_v9 }
  0x3c   : > { %2596 = vmatpush3.bf16.msra.mxu0 %v2800_v4 }
  0x3d   : > { %2616 = vmatpush3.bf16.msra.mxu1 %v2810_v9 }
  0x3e   : > { %2617 = vmatprep.subr.bf16.mxu1 %v2811_v11 }
  0x3f   : > { %2598 = vmatmul.mubr.msk.bf16.vlgmr.msra.gmra.mrb[0].mxu0 %vm610_vm0, %v2802_v6 }
  0x40   : > { %2601 = vmatprep.mubr.msk.bf16.mxu0 %vm610_vm0, %v2803_v7 }
  0x41   : > { %2618 = vmatpush3.bf16.msra.mxu1 %v2811_v11 }
  0x42   : > { %2619 = vmatprep.subr.bf16.mxu1 %v2812_v13 }
  0x45   : > { %2620 = vmatpush3.bf16.msra.mxu1 %v2812_v13 }
  0x46   : > { %2621 = vmatprep.subr.bf16.mxu1 %v2813_v15 }
  0x47   : > { %2602 = vmatmul.mubr.msk.bf16.gmra.mrb[4].mxu0 %vm610_vm0, %v2804_v10 }
  0x48   : > { %2605 = vmatprep.mubr.msk.bf16.mxu0 %vm610_vm0, %v2805_v12 }
  0x49   : > { %2622 = vmatpush3.bf16.msra.mxu1 %v2813_v15  ;;  %v2818_v15 = vld [vmem:[%s4088_s6 + $0x8] sm:$0xff]  }
  0x4a   : > { %2623 = vmatprep.subr.bf16.mxu1 %v2814_v17 }
  0x4d   : > { %2624 = vmatpush3.bf16.msra.mxu1 %v2814_v17 }
  0x4e   : > { %2625 = vmatprep.subr.bf16.mxu1 %v2815_v19 }
  0x4f   : > { %2606 = vmatmul.mubr.msk.bf16.gmra.mrb[8].mxu0 %vm610_vm0, %v2806_v14  ;;  %v2817_v14 = vld [vmem:[%s4088_s6] sm:$0xff]  }
  0x50   : > { %2609 = vmatprep.mubr.msk.bf16.mxu0 %vm610_vm0, %v2807_v16  ;;  %v3455_v16 = vld [vmem:[%s4089_s5] ss:$0 sm:$0xff]  ;;  %2645 = vmatprep.subr.bf16.mxu0 %v2817_v14 }
  0x51   : > { %2626 = vmatpush3.bf16.msra.mxu1 %v2815_v19  ;;  %2646 = vmatpush3.bf16.msra.mxu0 %v2817_v14 }
  0x52   : > { %2627 = vmatprep.subr.bf16.mxu1 %v2816_v20  ;;  %2647 = vmatprep.subr.bf16.mxu0 %v2818_v15 }
  0x55   : > { %2628 = vmatpush3.bf16.msra.mxu1 %v2816_v20  ;;  %v2819_v20 = vld [vmem:[%s4088_s6 + $0x10] sm:$0xff]   ;;  %2648 = vmatpush3.bf16.msra.mxu0 %v2818_v15 }
  0x56   : > { %2649 = vmatprep.subr.bf16.mxu0 %v2819_v20 }
  0x57   : > { %2610 = vmatmul.mubr.msk.bf16.gmra.mrb[12].mxu0 %vm610_vm0, %v2808_v18 }
  0x59   : > { %2650 = vmatpush3.bf16.msra.mxu0 %v2819_v20 }
 0x112   : > { %v2599_v22 = vpop.f32.mrb[0].mxu0 }
 0x113   : > { %v678_v23 = vadd.f32 %v2599_v22, %v2302_v21  ;;  %v669_v24 = vpop.f32.mrb[1].mxu0 }
 0x114   : > { %v670_v25 = vadd.f32 %v2302_v21, %v669_v24  ;;  %v2600_v26 = vpop.f32.mrb[2].mxu0 }
 0x115   : > { %v681_v27 = vadd.f32 %v2600_v26, %v2302_v21  ;;  %v672_v28 = vpop.f32.mrb[3].mxu0  ;;  %v734_v30 = vmax.f32 %v678_v23, 0.0 }
 0x116   : > { %v673_v29 = vadd.f32 %v2302_v21, %v672_v28  ;;  %v732_v32 = vmax.f32 %v670_v25, 0.0 }
 0x117   : > { %v735_v31 = vmax.f32 %v681_v27, 0.0 }
 0x118   : > { %v733_v33 = vmax.f32 %v673_v29, 0.0 }
 0x119   : > { %v3422_v34 = vpack.c.bf16 %v735_v31, %v734_v30 }
 0x11a   : > { %v2603_v35 = vpop.f32.mrb[4].mxu0  ;;  %v3424_v36 = vpack.c.bf16 %v733_v33, %v732_v32 }
 0x11b   : > { %v694_v37 = vadd.f32 %v2603_v35, %v2302_v21  ;;  %v685_v38 = vpop.f32.mrb[5].mxu0 }
 0x11c   : > { %v686_v39 = vadd.f32 %v2302_v21, %v685_v38  ;;  %v2604_v40 = vpop.f32.mrb[6].mxu0  ;;  %2629 = vmatprep.mubr.bf16.mxu1 %v3424_v36 }
 0x11d   : > { %v697_v41 = vadd.f32 %v2604_v40, %v2302_v21  ;;  %v688_v42 = vpop.f32.mrb[7].mxu0  ;;  %2630 = vmatmul.mubr.bf16.vlgmr.msra.gmra.mrb[0].mxu1 %v3422_v34  ;;  %v738_v44 = vmax.f32 %v694_v37, 0.0 }
 0x11e   : > { %v689_v43 = vadd.f32 %v2302_v21, %v688_v42  ;;  %v736_v46 = vmax.f32 %v686_v39, 0.0 }
 0x11f   : > { %v739_v45 = vmax.f32 %v697_v41, 0.0 }
 0x120   : > { %v737_v47 = vmax.f32 %v689_v43, 0.0 }
 0x121   : > { %v3428_v48 = vpack.c.bf16 %v739_v45, %v738_v44 }
 0x122   : > { %v3430_v49 = vpack.c.bf16 %v737_v47, %v736_v46  ;;  %v2607_v50 = vpop.f32.mrb[8].mxu0 }
 0x123   : > { %v710_v51 = vadd.f32 %v2607_v50, %v2302_v21  ;;  %v701_v52 = vpop.f32.mrb[9].mxu0 }
 0x124   : > { %v702_v53 = vadd.f32 %v2302_v21, %v701_v52  ;;  %v2608_v54 = vpop.f32.mrb[10].mxu0  ;;  %2633 = vmatprep.mubr.bf16.mxu1 %v3430_v49  ;;  %v2820_v52 = vld [vmem:[%s4088_s6 + $0x18] sm:$0xff]  }
 0x125   : > { %v713_v55 = vadd.f32 %v2608_v54, %v2302_v21  ;;  %v704_v56 = vpop.f32.mrb[11].mxu0  ;;  %2634 = vmatmul.mubr.bf16.gmra.mrb[4].mxu1 %v3428_v48  ;;  %v742_v58 = vmax.f32 %v710_v51, 0.0  ;;  %2651 = vmatprep.subr.bf16.mxu0 %v2820_v52 }
 0x126   : > { %v705_v57 = vadd.f32 %v2302_v21, %v704_v56  ;;  %v740_v60 = vmax.f32 %v702_v53, 0.0  ;;  %2652 = vmatpush3.bf16.msra.mxu0 %v2820_v52 }
 0x127   : > { %v743_v59 = vmax.f32 %v713_v55, 0.0 }
 0x128   : > { %v741_v61 = vmax.f32 %v705_v57, 0.0 }
 0x129   : > { %v3434_v62 = vpack.c.bf16 %v743_v59, %v742_v58 }
 0x12a   : > { %v3436_v63 = vpack.c.bf16 %v741_v61, %v740_v60  ;;  %v2611_v0 = vpop.f32.mrb[12].mxu0 }
 0x12b   : > { %v726_v1 = vadd.f32 %v2611_v0, %v2302_v21  ;;  %v717_v2 = vpop.f32.mrb[13].mxu0 }
 0x12c   : > { %v718_v3 = vadd.f32 %v2302_v21, %v717_v2  ;;  %v2612_v4 = vpop.f32.mrb[14].mxu0  ;;  %2637 = vmatprep.mubr.bf16.mxu1 %v3436_v63 }
 0x12d   : > { %v729_v5 = vadd.f32 %v2612_v4, %v2302_v21  ;;  %v720_v6 = vpop.f32.mrb[15].mxu0  ;;  %2638 = vmatmul.mubr.bf16.gmra.mrb[8].mxu1 %v3434_v62  ;;  %v746_v8 = vmax.f32 %v726_v1, 0.0 }
 0x12e   : > { %v721_v7 = vadd.f32 %v2302_v21, %v720_v6  ;;  %v744_v10 = vmax.f32 %v718_v3, 0.0 }
 0x12f   : > { %v747_v9 = vmax.f32 %v729_v5, 0.0 }
 0x130   : > { %v745_v11 = vmax.f32 %v721_v7, 0.0 }
 0x131   : > { %v3440_v12 = vpack.c.bf16 %v747_v9, %v746_v8 }
 0x132   : > { %v3442_v13 = vpack.c.bf16 %v745_v11, %v744_v10 }
 0x134   : > { %2641 = vmatprep.mubr.bf16.mxu1 %v3442_v13 }
 0x135   : > { %2642 = vmatmul.mubr.bf16.gmra.mrb[12].mxu1 %v3440_v12 }
 0x1f0   : > { %v2631_v17 = vpop.f32.mrb[0].mxu1 }
 0x1f1   : > { %v3458_v18 = vadd.f32 %v2631_v17, %v3455_v16  ;;  %v861_v19 = vpop.f32.mrb[1].mxu1 }
 0x1f2   : > { %v3464_v21 = vadd.f32 %v3455_v16, %v861_v19  ;;  %v2632_v22 = vpop.f32.mrb[2].mxu1 }
 0x1f3   : > { %v2332_v23 = vmul.f32 -1.442695, %v3458_v18  ;;  %v3468_v24 = vadd.f32 %v2632_v22, %v3455_v16  ;;  %v864_v25 = vpop.f32.mrb[3].mxu1 }
 0x1f4   : > { %v2330_v26 = vmul.f32 -1.442695, %v3464_v21  ;;  %v3472_v27 = vadd.f32 %v3455_v16, %v864_v25 }
 0x1f5   : > { %2821 = vpow2.f32 %v2332_v23  ;;  %v2333_v28 = vmul.f32 -1.442695, %v3468_v24 }
 0x1f6   : > { %2823 = vpow2.f32 %v2330_v26  ;;  %v2331_v29 = vmul.f32 -1.442695, %v3472_v27 }
 0x1f7   : > { %2825 = vpow2.f32 %v2333_v28 }
 0x1f8   : > { %v2635_v30 = vpop.f32.mrb[4].mxu1  ;;  %2827 = vpow2.f32 %v2331_v29 }
 0x1f9   : > { %v3477_v31 = vadd.f32 %v2635_v30, %v3455_v16  ;;  %v877_v32 = vpop.f32.mrb[5].mxu1 }
 0x1fa   : > { %v3480_v33 = vadd.f32 %v3455_v16, %v877_v32  ;;  %v2636_v35 = vpop.f32.mrb[6].mxu1 }
 0x1fb   : > { %v2336_v37 = vmul.f32 -1.442695, %v3477_v31  ;;  %v3484_v38 = vadd.f32 %v2636_v35, %v3455_v16  ;;  %v880_v39 = vpop.f32.mrb[7].mxu1 }
 0x1fc   : > { %v2334_v40 = vmul.f32 -1.442695, %v3480_v33  ;;  %v3488_v41 = vadd.f32 %v3455_v16, %v880_v39 }
 0x1fd   : > { %2829 = vpow2.f32 %v2336_v37  ;;  %v2337_v42 = vmul.f32 -1.442695, %v3484_v38 }
 0x1fe   : > { %2831 = vpow2.f32 %v2334_v40  ;;  %v2335_v46 = vmul.f32 -1.442695, %v3488_v41 }
 0x1ff   : > { %v2822_v43 = vpop.eup %2821  ;;  %2833 = vpow2.f32 %v2337_v42 }
 0x200   : > { %v2824_v44 = vpop.eup %2823  ;;  %v990_v45 = vadd.f32 1.0, %v2822_v43  ;;  %v2639_v47 = vpop.f32.mrb[8].mxu1 }
 0x201   : > { %v988_v50 = vadd.f32 1.0, %v2824_v44  ;;  %v893_v51 = vpop.f32.mrb[9].mxu1  ;;  %v2826_v53 = vpop.eup %2825  ;;  %v3496_v54 = vadd.f32 %v2639_v47, %v3455_v16 }
 0x202   : > { %2835 = vrcp.f32 %v990_v45  ;;  %v2640_v55 = vpop.f32.mrb[10].mxu1  ;;  %v991_v56 = vadd.f32 1.0, %v2826_v53  ;;  %v2828_v58 = vpop.eup %2827  ;;  %v3499_v59 = vadd.f32 %v3455_v16, %v893_v51 }
 0x203   : > { %2837 = vrcp.f32 %v988_v50  ;;  %v896_v57 = vpop.f32.mrb[11].mxu1  ;;  %v989_v60 = vadd.f32 1.0, %v2828_v58  ;;  %v2340_v61 = vmul.f32 -1.442695, %v3496_v54  ;;  %v3504_v3 = vadd.f32 %v2640_v55, %v3455_v16 }
 0x204   : > { %2839 = vpow2.f32 %v2335_v46  ;;  %v2338_v2 = vmul.f32 -1.442695, %v3499_v59  ;;  %v3507_v7 = vadd.f32 %v3455_v16, %v896_v57 }
 0x205   : > { %2841 = vrcp.f32 %v991_v56  ;;  %v2341_v15 = vmul.f32 -1.442695, %v3504_v3 }
 0x206   : > { %2843 = vrcp.f32 %v989_v60  ;;  %v2339_v20 = vmul.f32 -1.442695, %v3507_v7 }
 0x207   : > { %v2830_v0 = vpop.eup %2829  ;;  %2845 = vpow2.f32 %v2340_v61 }
 0x208   : > { %v2832_v1 = vpop.eup %2831  ;;  %v2643_v4 = vpop.f32.mrb[12].mxu1  ;;  %v994_v10 = vadd.f32 1.0, %v2830_v0 }
 0x209   : > { %v992_v5 = vadd.f32 1.0, %v2832_v1  ;;  %v909_v6 = vpop.f32.mrb[13].mxu1  ;;  %v2834_v9 = vpop.eup %2833  ;;  %v3513_v22 = vadd.f32 %v2643_v4, %v3455_v16 }
 0x20a   : > { %v2644_v8 = vpop.f32.mrb[14].mxu1  ;;  %v3517_v25 = vadd.f32 %v3455_v16, %v909_v6  ;;  %v995_v29 = vadd.f32 1.0, %v2834_v9 }
 0x20b   : > { %2847 = vrcp.f32 %v992_v5  ;;  %v912_v11 = vpop.f32.mrb[15].mxu1  ;;  %v2344_v30 = vmul.f32 -1.442695, %v3513_v22  ;;  %v3524_v37 = vadd.f32 %v2644_v8, %v3455_v16 }
 0x20c   : > { %v2836_v14 = vpop.eup %2835  ;;  %2849 = vpow2.f32 %v2338_v2  ;;  %v2342_v32 = vmul.f32 -1.442695, %v3517_v25  ;;  %v3527_v40 = vadd.f32 %v3455_v16, %v912_v11 }
 0x20d   : > { %v2838_v17 = vpop.eup %2837  ;;  %1056 = vrot.lane.b32.xlu1 %v2836_v14, %s4067_s25  ;;  %2851 = vrcp.f32 %v994_v10  ;;  %v2345_v45 = vmul.f32 -1.442695, %v3524_v37 }
 0x20e   : > { %v2840_v19 = vpop.eup %2839  ;;  %1052 = vrot.lane.b32.xlu0 %v2838_v17, %s4067_s25  ;;  %2853 = vpow2.f32 %v2341_v15  ;;  %v2343_v47 = vmul.f32 -1.442695, %v3527_v40 }
 0x20f   : > { %v993_v23 = vadd.f32 1.0, %v2840_v19  ;;  %v2842_v26 = vpop.eup %2841 }
 0x210   : > { %v2844_v28 = vpop.eup %2843 }
 0x211   : > { %2855 = vrcp.f32 %v993_v23  ;;  %1058 = vrot.lane.b32.xlu1 %v2842_v26, %s4067_s25  ;;  %v2846_v35 = vpop.eup %2845 }
 0x212   : > { %2857 = vpow2.f32 %v2339_v20  ;;  %1054 = vrot.lane.b32.xlu0 %v2844_v28, %s4067_s25  ;;  %v998_v43 = vadd.f32 1.0, %v2846_v35 }
 0x213   : > { %2859 = vrcp.f32 %v995_v29 }
 0x214   : > { %2861 = vpow2.f32 %v2344_v30 }
 0x215   : > { %v2848_v39 = vpop.eup %2847  ;;  %2863 = vpow2.f32 %v2342_v32 }
 0x216   : > { %v2850_v42 = vpop.eup %2849  ;;  %1060 = vrot.lane.b32.xlu0 %v2848_v39, %s4067_s25 }
 0x217   : > { %v996_v44 = vadd.f32 1.0, %v2850_v42  ;;  %v2852_v46 = vpop.eup %2851 }
 0x218   : > { %v2854_v50 = vpop.eup %2853 }
 0x219   : > { %2865 = vrcp.f32 %v996_v44  ;;  %v999_v55 = vadd.f32 1.0, %v2854_v50 }
 0x21a   : > { %1064 = vrot.lane.b32.xlu0 %v2852_v46, %s4067_s25  ;;  %2867 = vrcp.f32 %v998_v43 }
 0x21b   : > { %v2856_v51 = vpop.eup %2855  ;;  %2869 = vpow2.f32 %v2345_v45 }
 0x21c   : > { %v2858_v16 = vpop.eup %2857  ;;  %1062 = vrot.lane.b32.xlu1 %v2856_v51, %s4067_s25  ;;  %2871 = vpow2.f32 %v2343_v47 }
 0x21d   : > { %v997_v52 = vadd.f32 1.0, %v2858_v16  ;;  %v2860_v53 = vpop.eup %2859 }
 0x21e   : > { %v2862_v56 = vpop.eup %2861 }
 0x21f   : > { %2873 = vrcp.f32 %v997_v52  ;;  %v2864_v57 = vpop.eup %2863  ;;  %v1002_v61 = vadd.f32 1.0, %v2862_v56 }
 0x220   : > { %1066 = vrot.lane.b32.xlu1 %v2860_v53, %s4067_s25  ;;  %v1000_v58 = vadd.f32 1.0, %v2864_v57  ;;  %2875 = vrcp.f32 %v999_v55 }
 0x222   : > { %2877 = vrcp.f32 %v1000_v58 }
 0x223   : > { %v2866_v60 = vpop.eup %2865  ;;  %2879 = vrcp.f32 %v1002_v61 }
 0x224   : > { %1068 = vrot.lane.b32.xlu0 %v2866_v60, %s4067_s25  ;;  %v2868_v0 = vpop.eup %2867 }
 0x225   : > { %v2870_v1 = vpop.eup %2869 }
 0x226   : > { %v2872_v2 = vpop.eup %2871  ;;  %v1003_v6 = vadd.f32 1.0, %v2870_v1 }
 0x227   : > { %v1001_v4 = vadd.f32 1.0, %v2872_v2 }
 0x228   : > { %1072 = vrot.lane.b32.xlu0 %v2868_v0, %s4067_s25 }
 0x229   : > { %v2874_v5 = vpop.eup %2873  ;;  %2881 = vrcp.f32 %v1001_v4 }
 0x22a   : > { %1070 = vrot.lane.b32.xlu1 %v2874_v5, %s4067_s25  ;;  %v2876_v8 = vpop.eup %2875  ;;  %2883 = vrcp.f32 %v1003_v6  ;;  %v1367_v6 = vlaneseq }
 0x22b   : > { %2885 = vtanh.f32 %v3458_v18 }
 0x22c   : > { %v2878_v9 = vpop.eup %2877  ;;  %2887 = vtanh.f32 %v3464_v21 }
 0x22d   : > { %1076 = vrot.lane.b32.xlu0 %v2878_v9, %s4067_s25  ;;  %v2880_v10 = vpop.eup %2879  ;;  %2889 = vtanh.f32 %v3468_v24  ;;  %v3580_v9 = vld [vmem:[%s4090_s7] ss:$0 sm:$0xff] }
 0x22e   : > { %1074 = vrot.lane.b32.xlu1 %v2876_v8, %s4067_s25  ;;  %2891 = vtanh.f32 %v3472_v27 }
 0x22f   : > { %2893 = vtanh.f32 %v3480_v33 }
 0x230   : > { %2895 = vtanh.f32 %v3488_v41 }
 0x231   : > { %1080 = vrot.lane.b32.xlu0 %v2880_v10, %s4067_s25  ;;  %2897 = vtanh.f32 %v3477_v31 }
 0x232   : > { %2899 = vtanh.f32 %v3484_v38 }
 0x233   : > { %v2882_v11 = vpop.eup %2881  ;;  %2901 = vtanh.f32 %v3499_v59 }
 0x234   : > { %1078 = vrot.lane.b32.xlu1 %v2882_v11, %s4067_s25  ;;  %v2884_v14 = vpop.eup %2883  ;;  %2903 = vtanh.f32 %v3507_v7  ;;  %v3582_v11 = vshrl.u32 %v1367_v6, 7 }
 0x235   : > { %2905 = vtanh.f32 %v3496_v54 }
 0x236   : > { %2907 = vtanh.f32 %v3504_v3 }
 0x237   : > { %2909 = vtanh.f32 %v3517_v25 }
 0x238   : > { %1082 = vrot.lane.b32.xlu1 %v2884_v14, %s4067_s25  ;;  %2911 = vtanh.f32 %v3527_v40 }
 0x239   : > { %2913 = vtanh.f32 %v3513_v22 }
 0x23a   : > { %2915 = vtanh.f32 %v3524_v37 }
 0x24f   : > { %1690 = vxpose.xlu0.c.b16.start [1/8] %v3424_v36, 128 }
 0x253   : > { %1691 = vxpose.xlu0.c.b16.cont [2/8] %v3422_v34, 128 }
 0x257   : > { %1692 = vxpose.xlu0.c.b16.cont [3/8] %v3430_v49, 128  ;;  %v2886_v49 = vpop.eup %2885 }
 0x25b   : > { %1693 = vxpose.xlu0.c.b16.cont [4/8] %v3428_v48, 128  ;;  %v2888_v48 = vpop.eup %2887 }
 0x25c   : > { %v2890_v15 = vpop.eup %2889 }
 0x25f   : > { %1694 = vxpose.xlu0.c.b16.cont [5/8] %v3436_v63, 128  ;;  %v2892_v63 = vpop.eup %2891 }
 0x260   : > { %v2894_v33 = vpop.eup %2893 }
 0x261   : > { %v2896_v20 = vpop.eup %2895 }
 0x262   : > { %v2898_v29 = vpop.eup %2897 }
 0x263   : > { %1695 = vxpose.xlu0.c.b16.cont [6/8] %v3434_v62, 128  ;;  %v2900_v32 = vpop.eup %2899 }
 0x264   : > { %v2902_v43 = vpop.eup %2901 }
 0x265   : > { %v2904_v44 = vpop.eup %2903 }
 0x266   : > { %v2906_v47 = vpop.eup %2905 }
 0x267   : > { %1696 = vxpose.xlu0.c.b16.cont [7/8] %v3442_v13, 128  ;;  %v2908_v51 = vpop.eup %2907 }
 0x268   : > { %v2910_v40 = vpop.eup %2909 }
 0x269   : > { %v2912_v53 = vpop.eup %2911 }
 0x26a   : > { %v2914_v60 = vpop.eup %2913 }
 0x26b   : > { %1697 = vxpose.xlu0.c.b16.end [8/8] %v3440_v12, 128  ;;  %v2916_v22 = vpop.eup %2915 }
 0x27f   : > { %v1057_v34 = vpop.permute.xlu1 %1056 }
 0x280   : > { %v1053_v36 = vpop.permute.xlu0 %1052  ;;  %v1102_v12 = vmul.f32 %v2886_v49, %v1057_v34 }
 0x281   : > { %v1100_v17 = vmul.f32 %v2888_v48, %v1053_v36 }
 0x283   : > { %v1059_v62 = vpop.permute.xlu1 %1058 }
 0x284   : > { %v1103_v13 = vmul.f32 %v2890_v15, %v1059_v62  ;;  %v1055_v18 = vpop.permute.xlu0 %1054 }
 0x285   : > { %v1101_v21 = vmul.f32 %v2892_v63, %v1055_v18  ;;  %v1370_v63 = vadd.s32 16, %v3582_v11  ;;  %v3591_v18 = vstv %s2375_s22 }
 0x286   : > { %v1117_v19 = vpack.c.bf16 %v1103_v13, %v1102_v12  ;;  %v1374_v13 = vadd.s32 48, %v3582_v11 }
 0x287   : > { %v1116_v24 = vpack.c.bf16 %v1101_v21, %v1100_v17  ;;  %v1371_v17 = vadd.s32 24, %v3582_v11 }
 0x288   : > { %v1061_v27 = vpop.permute.xlu0 %1060 }
 0x289   : > { %2653 = vmatprep.mubr.msk.bf16.mxu0 %vm1163_vm1, %v1116_v24  ;;  %v1104_v23 = vmul.f32 %v2894_v33, %v1061_v27  ;;  %v1369_v24 = vadd.s32 8, %v3582_v11  ;;  %v1375_v27 = vadd.s32 56, %v3582_v11  ;;  %v1373_v33 = vadd.s32 40, %v3582_v11 }
 0x28a   : > { %2654 = vmatmul.mubr.msk.bf16.vlgmr.msra.gmra.mrb[16].mxu0 %vm1163_vm1, %v1117_v19  ;;  %v1372_v19 = vadd.s32 32, %v3582_v11 }
 0x28c   : > { %v1065_v28 = vpop.permute.xlu0 %1064 }
 0x28d   : > { %v1106_v38 = vmul.f32 %v2898_v29, %v1065_v28  ;;  %v1388_v28 = vadd.s32 %v3591_v18, %v1371_v17  ;;  %v1389_v29 = vadd.s32 %v3591_v18, %v1372_v19 }
 0x28e   : > { %v1063_v41 = vpop.permute.xlu1 %1062 }
 0x28f   : > { %v1105_v26 = vmul.f32 %v2896_v20, %v1063_v41  ;;  %v1387_v20 = vadd.s32 %v3591_v18, %v1370_v63  ;;  %v1391_v41 = vadd.s32 %v3591_v18, %v1374_v13  ;;  %v1380_v63 = vadd.s32 96, %v3582_v11 }
 0x291   : > { %v1118_v30 = vpack.c.bf16 %v1105_v26, %v1104_v23  ;;  %v3602_v23 = vstv %s1365_s18  ;;  %v1385_v26 = vadd.s32 %v3591_v18, %v3582_v11 }
 0x292   : > { %v1067_v31 = vpop.permute.xlu1 %1066  ;;  %vm1404_vm2 = vcmp.lt.s32.totalorder %v1387_v20, %v3602_v23  ;;  %vm1408_vm3 = vcmp.lt.s32.totalorder %v1391_v41, %v3602_v23  ;;  %vm1405_vm5 = vcmp.lt.s32.totalorder %v1388_v28, %v3602_v23  ;;  %vm1406_vm6 = vcmp.lt.s32.totalorder %v1389_v29, %v3602_v23 }
 0x293   : > { %v1107_v35 = vmul.f32 %v2900_v32, %v1067_v31  ;;  %2657 = vmatprep.mubr.msk.bf16.mxu0 %vm1163_vm1, %v1118_v30  ;;  %v1386_v30 = vadd.s32 %v3591_v18, %v1369_v24  ;;  %v1392_v32 = vadd.s32 %v3591_v18, %v1375_v27  ;;  %v1390_v31 = vadd.s32 %v3591_v18, %v1373_v33 }
 0x294   : > { %vm1402_vm4 = vcmp.lt.s32.totalorder %v1385_v26, %v3602_v23  ;;  %v1381_v33 = vadd.s32 104, %v3582_v11  ;;  %v1397_v26 = vadd.s32 %v3591_v18, %v1380_v63 }
 0x295   : > { %v1119_v39 = vpack.c.bf16 %v1107_v35, %v1106_v38  ;;  %vm1403_vm7 = vcmp.lt.s32.totalorder %v1386_v30, %v3602_v23  ;;  %vm1409_vm8 = vcmp.lt.s32.totalorder %v1392_v32, %v3602_v23  ;;  %vm1407_vm9 = vcmp.lt.s32.totalorder %v1390_v31, %v3602_v23 }
 0x296   : > { %v1069_v42 = vpop.permute.xlu0 %1068  ;;  %v1398_v29 = vadd.s32 %v3591_v18, %v1381_v33  ;;  %vm1414_vm15 = vcmp.lt.s32.totalorder %v1397_v26, %v3602_v23 }
 0x297   : > { %2658 = vmatmul.mubr.msk.bf16.gmra.mrb[20].mxu0 %vm1163_vm1, %v1119_v39  ;;  %v1108_v7 = vmul.f32 %v2902_v43, %v1069_v42 }
 0x29a   : > { %v1073_v46 = vpop.permute.xlu0 %1072 }
 0x29b   : > { %v1110_v3 = vmul.f32 %v2906_v47, %v1073_v46  ;;  %v1378_v46 = vadd.s32 80, %v3582_v11 }
 0x29c   : > { %v1071_v59 = vpop.permute.xlu1 %1070 }
 0x29d   : > { %v1109_v45 = vmul.f32 %v2904_v44, %v1071_v59 }
 0x29f   : > { %v1120_v50 = vpack.c.bf16 %v1109_v45, %v1108_v7  ;;  %v1077_v25 = vpop.permute.xlu0 %1076 }
 0x2a0   : > { %v1075_v54 = vpop.permute.xlu1 %1074  ;;  %v1112_v56 = vmul.f32 %v2910_v40, %v1077_v25 }
 0x2a1   : > { %v1111_v16 = vmul.f32 %v2908_v51, %v1075_v54  ;;  %2661 = vmatprep.mubr.msk.bf16.mxu0 %vm1163_vm1, %v1120_v50 }
 0x2a3   : > { %v1121_v52 = vpack.c.bf16 %v1111_v16, %v1110_v3  ;;  %v1081_v58 = vpop.permute.xlu0 %1080 }
 0x2a4   : > { %v1114_v1 = vmul.f32 %v2914_v60, %v1081_v58  ;;  %v1376_v58 = vadd.s32 64, %v3582_v11  ;;  %v1379_v60 = vadd.s32 88, %v3582_v11 }
 0x2a5   : > { %2662 = vmatmul.mubr.msk.bf16.gmra.mrb[24].mxu0 %vm1163_vm1, %v1121_v52 }
 0x2a6   : > { %v1079_v55 = vpop.permute.xlu1 %1078 }
 0x2a7   : > { %v1113_v57 = vmul.f32 %v2912_v53, %v1079_v55 }
 0x2a9   : > { %v1122_v61 = vpack.c.bf16 %v1113_v57, %v1112_v56 }
 0x2aa   : > { %v1083_v0 = vpop.permute.xlu1 %1082 }
 0x2ab   : > { %v1115_v37 = vmul.f32 %v2916_v22, %v1083_v0  ;;  %2665 = vmatprep.mubr.msk.bf16.mxu0 %vm1163_vm1, %v1122_v61  ;;  %v1377_v61 = vadd.s32 72, %v3582_v11  ;;  %v1395_v22 = vadd.s32 %v3591_v18, %v1378_v46  ;;  %v1393_v0 = vadd.s32 %v3591_v18, %v1376_v58 }
 0x2ad   : > { %v1123_v2 = vpack.c.bf16 %v1115_v37, %v1114_v1  ;;  %v1396_v1 = vadd.s32 %v3591_v18, %v1379_v60  ;;  %v1394_v37 = vadd.s32 %v3591_v18, %v1377_v61  ;;  %vm1412_vm10 = vcmp.lt.s32.totalorder %v1395_v22, %v3602_v23 }
 0x2ae   : > { %vm1410_vm11 = vcmp.lt.s32.totalorder %v1393_v0, %v3602_v23 }
 0x2af   : > { %2666 = vmatmul.mubr.msk.bf16.gmra.mrb[28].mxu0 %vm1163_vm1, %v1123_v2  ;;  %vm1413_vm12 = vcmp.lt.s32.totalorder %v1396_v1, %v3602_v23  ;;  %vm1411_vm13 = vcmp.lt.s32.totalorder %v1394_v37, %v3602_v23  ;;  %vm1415_vm1 = vcmp.lt.s32.totalorder %v1398_v29, %v3602_v23  ;;  %v1466_v1 = vld [vmem:[#allocation2] sm:$0x1] }
 0x2b5   : > { %v1698_v4 = vpop.trf.xlu0 }
 0x2b6   : > { %2685 = vmatprep.mubr.bf16.mxu0 %v1698_v4 }
 0x2b9   : > { %v3575_v5 = vpop.trf.xlu0 }
 0x2bd   : > { %v1700_v10 = vpop.trf.xlu0 }
 0x2be   : > { %2689 = vmatprep.mubr.bf16.mxu1 %v1700_v10 }
 0x35d   : > { %v2655_v8 = vpop.f32.mrb[16].mxu0 }
 0x35e   : > { %v1222_v14 = vpop.f32.mrb[17].mxu0  ;;  %v1231_v36 = vadd.f32 %v2655_v8, %v3580_v9 }
 0x35f   : > { %v2656_v34 = vpop.f32.mrb[18].mxu0  ;;  %v1223_v15 = vadd.f32 %v3580_v9, %v1222_v14 }
 0x360   : > { %v1234_v49 = vadd.f32 %v2656_v34, %v3580_v9  ;;  %v1225_v48 = vpop.f32.mrb[19].mxu0  ;;  %v3621_v44 = vsel %vm1404_vm2, %v1231_v36, -1e+30 }
 0x361   : > { %v1226_v62 = vadd.f32 %v3580_v9, %v1225_v48  ;;  %v3627_v47 = vsel %vm1402_vm4, %v1223_v15, -1e+30 }
 0x362   : > { %v2453_v12 = vpack.c.bf16 %v1234_v49, %v1231_v36  ;;  %v3636_v3 = vsel %vm1405_vm5, %v1234_v49, -1e+30  ;;  %v1382_v49 = vadd.s32 112, %v3582_v11 }
 0x363   : > { %v2448_v21 = vpack.c.bf16 %v1226_v62, %v1223_v15  ;;  %v3644_v40 = vsel %vm1403_vm7, %v1226_v62, -1e+30 }
 0x364   : > { %2525 = vst [vmem:[%s3370_s0 + $0x8] sm:$0xff] %v2453_v12   ;;  %v1399_v41 = vadd.s32 %v3591_v18, %v1382_v49 }
 0x365   : > { %2449 = vst [vmem:[%s3370_s0] sm:$0xff] %v2448_v21   ;;  %v1383_v21 = vadd.s32 120, %v3582_v11 }
 0x366   : > { %vm1416_vm14 = vcmp.lt.s32.totalorder %v1399_v41, %v3602_v23 }
 0x367   : > { %v1400_v28 = vadd.s32 %v3591_v18, %v1383_v21 }
 0x369   : > { %vm1417_vm0 = vcmp.lt.s32.totalorder %v1400_v28, %v3602_v23 }
 0x36a   : > { %v2659_v38 = vpop.f32.mrb[20].mxu0 }
 0x36b   : > { %v1247_v35 = vadd.f32 %v2659_v38, %v3580_v9  ;;  %v1238_v39 = vpop.f32.mrb[21].mxu0 }
 0x36c   : > { %v1239_v42 = vadd.f32 %v3580_v9, %v1238_v39  ;;  %v2660_v43 = vpop.f32.mrb[22].mxu0 }
 0x36d   : > { %v3623_v59 = vsel %vm1408_vm3, %v1247_v35, -1e+30  ;;  %v1250_v7 = vadd.f32 %v2660_v43, %v3580_v9  ;;  %v1241_v45 = vpop.f32.mrb[23].mxu0 }
 0x36e   : > { %v1469_v50 = vmax.f32 %v3621_v44, %v3623_v59  ;;  %v3631_v51 = vsel %vm1406_vm6, %v1239_v42, -1e+30  ;;  %v1242_v54 = vadd.f32 %v3580_v9, %v1241_v45 }
 0x36f   : > { %v1467_v16 = vmax.f32 %v3627_v47, %v3631_v51  ;;  %v2463_v52 = vpack.c.bf16 %v1250_v7, %v1247_v35  ;;  %v3640_v25 = vsel %vm1409_vm8, %v1250_v7, -1e+30 }
 0x370   : > { %v1470_v53 = vmax.f32 %v3636_v3, %v3640_v25  ;;  %v2458_v55 = vpack.c.bf16 %v1242_v54, %v1239_v42  ;;  %v3650_v56 = vsel %vm1407_vm9, %v1242_v54, -1e+30 }
 0x371   : > { %2527 = vst [vmem:[%s3370_s0 + $0x18] sm:$0xff] %v2463_v52   ;;  %v1468_v57 = vmax.f32 %v3644_v40, %v3650_v56 }
 0x372   : > { %2526 = vst [vmem:[%s3370_s0 + $0x10] sm:$0xff] %v2458_v55  }
 0x378   : > { %v2663_v2 = vpop.f32.mrb[24].mxu0 }
 0x379   : > { %v1263_v4 = vadd.f32 %v2663_v2, %v3580_v9  ;;  %v1254_v6 = vpop.f32.mrb[25].mxu0  ;;  %v3716_v2 = vsub.s32 0, %v3582_v11 }
 0x37a   : > { %v1255_v8 = vadd.f32 %v3580_v9, %v1254_v6  ;;  %v2664_v10 = vpop.f32.mrb[26].mxu0 }
 0x37b   : > { %v3668_v14 = vsel %vm1412_vm10, %v1263_v4, -1e+30  ;;  %v1266_v34 = vadd.f32 %v2664_v10, %v3580_v9  ;;  %v1257_v36 = vpop.f32.mrb[27].mxu0 }
 0x37c   : > { %v1473_v48 = vmax.f32 %v1469_v50, %v3668_v14  ;;  %v3674_v15 = vsel %vm1410_vm11, %v1255_v8, -1e+30  ;;  %v1258_v62 = vadd.f32 %v3580_v9, %v1257_v36 }
 0x37d   : > { %v1471_v12 = vmax.f32 %v1467_v16, %v3674_v15  ;;  %v2473_v13 = vpack.c.bf16 %v1266_v34, %v1263_v4  ;;  %v3679_v17 = vsel %vm1413_vm12, %v1266_v34, -1e+30 }
 0x37e   : > { %v1474_v19 = vmax.f32 %v1470_v53, %v3679_v17  ;;  %v2468_v24 = vpack.c.bf16 %v1258_v62, %v1255_v8  ;;  %v3683_v27 = vsel %vm1411_vm13, %v1258_v62, -1e+30 }
 0x37f   : > { %2529 = vst [vmem:[%s3370_s0 + $0x28] sm:$0xff] %v2473_v13   ;;  %v1472_v20 = vmax.f32 %v1468_v57, %v3683_v27 }
 0x380   : > { %2528 = vst [vmem:[%s3370_s0 + $0x20] sm:$0xff] %v2468_v24  }
 0x382   : > { %v2667_v30 = vpop.f32.mrb[28].mxu0 }
 0x383   : > { %v1279_v32 = vadd.f32 %v2667_v30, %v3580_v9  ;;  %v1270_v31 = vpop.f32.mrb[29].mxu0 }
 0x384   : > { %v1271_v38 = vadd.f32 %v3580_v9, %v1270_v31  ;;  %v2668_v35 = vpop.f32.mrb[30].mxu0 }
 0x385   : > { %v3698_v39 = vsel %vm1416_vm14, %v1279_v32, -1e+30  ;;  %v1282_v42 = vadd.f32 %v2668_v35, %v3580_v9  ;;  %v1273_v18 = vpop.f32.mrb[31].mxu0 }
 0x386   : > { %v1477_v43 = vmax.f32 %v1473_v48, %v3698_v39  ;;  %v3703_v7 = vsel %vm1414_vm15, %v1271_v38, -1e+30  ;;  %v1274_v45 = vadd.f32 %v3580_v9, %v1273_v18 }
 0x387   : > { %v1475_v46 = vmax.f32 %v1471_v12, %v3703_v7  ;;  %v2483_v50 = vpack.c.bf16 %v1282_v42, %v1279_v32  ;;  %v3707_v54 = vsel %vm1417_vm0, %v1282_v42, -1e+30 }
 0x388   : > { %v1478_v16 = vmax.f32 %v1474_v19, %v3707_v54  ;;  %v2478_v52 = vpack.c.bf16 %v1274_v45, %v1271_v38  ;;  %v3710_v53 = vsel %vm1415_vm1, %v1274_v45, -1e+30 }
 0x389   : > { %2531 = vst [vmem:[%s3370_s0 + $0x38] sm:$0xff] %v2483_v50   ;;  %v1476_v55 = vmax.f32 %v1472_v20, %v3710_v53 }
 0x38a   : > { %v1480_v23 = vmax.f32 %v1477_v43, %v1478_v16  ;;  %2530 = vst [vmem:[%s3370_s0 + $0x30] sm:$0xff] %v2478_v52  }
 0x38b   : > { %v1479_v57 = vmax.f32 %v1475_v46, %v1476_v55 }
 0x38d   : > { %v1481_v58 = vmax.f32 %v1479_v57, %v1480_v23 }
 0x38f   : > { %v1482_v60 = vrot.slane %v1481_v58, 4 }
 0x391   : > { %v1483_v9 = vmax.f32 %v1481_v58, %v1482_v60 }
 0x393   : > { %v1484_v61 = vrot.slane %v1483_v9, 2 }
 0x395   : > { %v1485_v22 = vmax.f32 %v1483_v9, %v1484_v61 }
 0x397   : > { %v1486_v0 = vrot.slane %v1485_v22, 1 }
 0x399   : > { %v1487_v37 = vmax.f32 %v1485_v22, %v1486_v0 }
 0x39b   : > { %v1488_v4 = vmax.f32 %v1466_v1, %v1487_v37 }
 0x39d   : > { %v1489_v6 = vsub.f32 %v1466_v1, %v1488_v4  ;;  %v1496_v8 = vrot.slane %v1488_v4, %v3716_v2  ;;  %1626 = vst [vmem:[%s3368_s28] sm:$0x1] %v1488_v4  ;;  %1835 = vst [vmem:[#allocation2] sm:$0x1] %v1488_v4 }
 0x39f   : > { %v1490_v10 = vmul.f32 1.442695, %v1489_v6  ;;  %v1498_v34 = vsub.f32 %v3627_v47, %v1496_v8  ;;  %v1499_v36 = vsub.f32 %v3644_v40, %v1496_v8  ;;  %v1500_v49 = vsub.f32 %v3621_v44, %v1496_v8 }
 0x3a0   : > { %v1501_v48 = vsub.f32 %v3636_v3, %v1496_v8  ;;  %v1502_v62 = vsub.f32 %v3631_v51, %v1496_v8  ;;  %v1503_v11 = vsub.f32 %v3650_v56, %v1496_v8  ;;  %v1504_v63 = vsub.f32 %v3623_v59, %v1496_v8 }
 0x3a1   : > { %2917 = vpow2.f32 %v1490_v10  ;;  %v1505_v12 = vsub.f32 %v3640_v25, %v1496_v8  ;;  %v1506_v13 = vsub.f32 %v3674_v15, %v1496_v8  ;;  %v1507_v21 = vsub.f32 %v3683_v27, %v1496_v8 }
 0x3a2   : > { %v1508_v47 = vsub.f32 %v3668_v14, %v1496_v8  ;;  %v1509_v40 = vsub.f32 %v3679_v17, %v1496_v8  ;;  %v1510_v44 = vsub.f32 %v3703_v7, %v1496_v8  ;;  %v1511_v3 = vsub.f32 %v3710_v53, %v1496_v8 }
 0x3a3   : > { %v1512_v51 = vsub.f32 %v3698_v39, %v1496_v8  ;;  %v1513_v56 = vsub.f32 %v3707_v54, %v1496_v8  ;;  %v1514_v59 = vmul.f32 1.442695, %v1498_v34  ;;  %v1516_v19 = vmul.f32 1.442695, %v1499_v36 }
 0x3a4   : > { %v1518_v24 = vmul.f32 1.442695, %v1500_v49  ;;  %v1520_v25 = vmul.f32 1.442695, %v1501_v48  ;;  %v1522_v15 = vmul.f32 1.442695, %v1502_v62 }
 0x3a5   : > { %2919 = vpow2.f32 %v1514_v59  ;;  %v1524_v27 = vmul.f32 1.442695, %v1503_v11  ;;  %v1526_v14 = vmul.f32 1.442695, %v1504_v63  ;;  %v1528_v17 = vmul.f32 1.442695, %v1505_v12 }
 0x3a6   : > { %2921 = vpow2.f32 %v1516_v19  ;;  %v1530_v33 = vmul.f32 1.442695, %v1506_v13  ;;  %v1532_v20 = vmul.f32 1.442695, %v1507_v21  ;;  %v1534_v26 = vmul.f32 1.442695, %v1508_v47  ;;  %v1701_v13 = vpop.trf.xlu0 }
 0x3a7   : > { %2923 = vpow2.f32 %v1518_v24  ;;  %v1536_v28 = vmul.f32 1.442695, %v1509_v40  ;;  %v1538_v30 = vmul.f32 1.442695, %v1510_v44  ;;  %v1540_v32 = vmul.f32 1.442695, %v1511_v3 }
 0x3a8   : > { %2925 = vpow2.f32 %v1520_v25  ;;  %v1542_v38 = vmul.f32 1.442695, %v1512_v51  ;;  %v1544_v39 = vmul.f32 1.442695, %v1513_v56  ;;  %v1627_v24 = vld [vmem:[#allocation3] sm:$0x1] }
 0x3a9   : > { %2927 = vpow2.f32 %v1522_v15 }
 0x3aa   : > { %2929 = vpow2.f32 %v1524_v27  ;;  %v1702_v44 = vpop.trf.xlu0 }
 0x3ab   : > { %v3736_v41 = vpop.eup %2917  ;;  %2931 = vpow2.f32 %v1526_v14 }
 0x3ac   : > { %2933 = vpow2.f32 %v1528_v17  ;;  %v3740_v29 = vrot.slane %v3736_v41, %v3716_v2  ;;  %v1628_v15 = vmul.f32 %v3736_v41, %v1627_v24  ;;  %v1657_v41 = vld [vmem:[#allocation4 + $0x28] sm:$0xff] }
 0x3ad   : > { %2935 = vpow2.f32 %v1530_v33 }
 0x3ae   : > { %2937 = vpow2.f32 %v1532_v20  ;;  %v1703_v59 = vpop.trf.xlu0  ;;  %v1654_v20 = vld [vmem:[#allocation4 + $0x10] sm:$0xff] }
 0x3af   : > { %v2920_v31 = vpop.eup %2919  ;;  %2939 = vpow2.f32 %v1534_v26  ;;  %v1658_v26 = vld [vmem:[#allocation4 + $0x30] sm:$0xff] }
 0x3b0   : > { %v2922_v35 = vpop.eup %2921  ;;  %2941 = vpow2.f32 %v1536_v28  ;;  %v1652_v28 = vld [vmem:[#allocation4] sm:$0xff] }
 0x3b1   : > { %v2924_v42 = vpop.eup %2923  ;;  %2943 = vpow2.f32 %v1538_v30  ;;  %v1629_v18 = vadd.f32 %v2922_v35, %v2920_v31  ;;  %v1546_v43 = vpack.c.bf16 %v2922_v35, %v2920_v31  ;;  %v1655_v30 = vld [vmem:[#allocation4 + $0x18] sm:$0xff]  ;;  %v1676_v31 = vmul.f32 %v3740_v29, %v1654_v20  ;;  %v1653_v35 = vld [vmem:[#allocation4 + $0x8] sm:$0xff] }
 0x3b2   : > { %v2926_v7 = vpop.eup %2925  ;;  %2945 = vpow2.f32 %v1540_v32  ;;  %v1704_v14 = vpop.trf.xlu0  ;;  %v1659_v32 = vld [vmem:[#allocation4 + $0x38] sm:$0xff] }
 0x3b3   : > { %v2928_v45 = vpop.eup %2927  ;;  %2947 = vpow2.f32 %v1542_v38  ;;  %v1630_v46 = vadd.f32 %v2924_v42, %v1629_v18  ;;  %2489 = vst [vmem:[%s3366_s19] sm:$0xff] %v1546_v43   ;;  %2669 = vmatprep.subr.bf16.mxu0 %v1546_v43  ;;  %2701 = vmatprep.subr.bf16.mxu1 %v1546_v43  ;;  %v1547_v50 = vpack.c.bf16 %v2926_v7, %v2924_v42 }
 0x3b4   : > { %v2930_v54 = vpop.eup %2929  ;;  %2949 = vpow2.f32 %v1544_v39  ;;  %2670 = vmatpush3.bf16.msra.mxu0 %v1546_v43  ;;  %2709 = vmatpush3.bf16.msra.mxu1 %v1546_v43  ;;  %v1680_v38 = vmul.f32 %v3740_v29, %v1658_v26  ;;  %v1674_v18 = vmul.f32 %v3740_v29, %v1652_v28  ;;  %v1886_v28 = vld [vmem:[%s4054_s8 + $0x10] sm:$0xff] (!%p2392_p12) }
 0x3b5   : > { %v2932_v16 = vpop.eup %2931  ;;  %v1631_v52 = vadd.f32 %v2926_v7, %v1630_v46  ;;  %2532 = vst [vmem:[%s3366_s19 + $0x8] sm:$0xff] %v1547_v50   ;;  %2671 = vmatprep.subr.bf16.mxu0 %v1547_v50  ;;  %2702 = vmatprep.subr.bf16.mxu1 %v1547_v50  ;;  %v1548_v53 = vpack.c.bf16 %v2930_v54, %v2928_v45 }
 0x3b6   : > { %v2934_v55 = vpop.eup %2933  ;;  %v1705_v33 = vpop.trf.xlu0 }
 0x3b7   : > { %v2936_v23 = vpop.eup %2935  ;;  %v1632_v57 = vadd.f32 %v2928_v45, %v1631_v52  ;;  %2533 = vst [vmem:[%s3366_s19 + $0x10] sm:$0xff] %v1548_v53   ;;  %v1549_v58 = vpack.c.bf16 %v2934_v55, %v2932_v16 }
 0x3b8   : > { %v2938_v60 = vpop.eup %2937  ;;  %2672 = vmatpush3.bf16.msra.mxu0 %v1547_v50  ;;  %2710 = vmatpush3.bf16.msra.mxu1 %v1547_v50 }
 0x3b9   : > { %v2940_v9 = vpop.eup %2939  ;;  %v1633_v61 = vadd.f32 %v2930_v54, %v1632_v57  ;;  %2673 = vmatprep.subr.bf16.mxu0 %v1548_v53  ;;  %2703 = vmatprep.subr.bf16.mxu1 %v1548_v53  ;;  %2534 = vst [vmem:[%s3366_s19 + $0x18] sm:$0xff] %v1549_v58   ;;  %v1550_v22 = vpack.c.bf16 %v2938_v60, %v2936_v23 }
 0x3ba   : > { %v2942_v0 = vpop.eup %2941  ;;  %v1677_v54 = vmul.f32 %v3740_v29, %v1655_v30  ;;  %v1675_v57 = vmul.f32 %v3740_v29, %v1653_v35  ;;  %v3206_v30 = vmov (!%p2392_p12), 0   ;;  %v1888_v35 = vld [vmem:[%s4054_s8 + $0x20] sm:$0xff] (!%p2392_p12) }
 0x3bb   : > { %v2944_v1 = vpop.eup %2943  ;;  %v1634_v37 = vadd.f32 %v2932_v16, %v1633_v61  ;;  %2535 = vst [vmem:[%s3366_s19 + $0x20] sm:$0xff] %v1550_v22   ;;  %v1551_v4 = vpack.c.bf16 %v2942_v0, %v2940_v9  ;;  %v1681_v16 = vmul.f32 %v3740_v29, %v1659_v32  ;;  %2952 = vset.pattern.permute.xlu1 (!%p2392_p12), %v3206_v30  ;;  %v1885_v32 = vld [vmem:[%s4054_s8 + $0x8] sm:$0xff] (!%p2392_p12) }
 0x3bc   : > { %v2946_v6 = vpop.eup %2945  ;;  %2674 = vmatpush3.bf16.msra.mxu0 %v1548_v53  ;;  %2711 = vmatpush3.bf16.msra.mxu1 %v1548_v53 }
 0x3bd   : > { %v2948_v8 = vpop.eup %2947  ;;  %v1635_v10 = vadd.f32 %v2934_v55, %v1634_v37  ;;  %2675 = vmatprep.subr.bf16.mxu0 %v1549_v58  ;;  %2704 = vmatprep.subr.bf16.mxu1 %v1549_v58  ;;  %2536 = vst [vmem:[%s3366_s19 + $0x28] sm:$0xff] %v1551_v4   ;;  %v1552_v34 = vpack.c.bf16 %v2946_v6, %v2944_v1  ;;  %v1662_v37 = vld [vmem:[#allocation4 + $0x50] sm:$0xff] }
 0x3be   : > { %v2950_v36 = vpop.eup %2949  ;;  %2951 = vset.pattern.permute.xlu0 (!%p2392_p12), %v3206_v30  ;;  %1912 = vperm.xlu1 (!%p2392_p12), %2952, %v1886_v28  }
 0x3bf   : > { %v1636_v49 = vadd.f32 %v2936_v23, %v1635_v10  ;;  %2537 = vst [vmem:[%s3366_s19 + $0x30] sm:$0xff] %v1552_v34   ;;  %v1553_v48 = vpack.c.bf16 %v2950_v36, %v2948_v8  ;;  %v1661_v10 = vld [vmem:[#allocation4 + $0x48] sm:$0xff] }
 0x3c0   : > { %2676 = vmatpush3.bf16.msra.mxu0 %v1549_v58  ;;  %2712 = vmatpush3.bf16.msra.mxu1 %v1549_v58  ;;  %v1679_v58 = vmul.f32 %v3740_v29, %v1657_v41  ;;  %v1891_v41 = vld [vmem:[%s4054_s8 + $0x38] sm:$0xff] (!%p2392_p12) }
 0x3c1   : > { %v1637_v62 = vadd.f32 %v2938_v60, %v1636_v49  ;;  %2677 = vmatprep.subr.bf16.mxu0 %v1550_v22  ;;  %2705 = vmatprep.subr.bf16.mxu1 %v1550_v22  ;;  %2538 = vst [vmem:[%s3366_s19 + $0x38] sm:$0xff] %v1553_v48  }
 0x3c3   : > { %v1638_v11 = vadd.f32 %v2940_v9, %v1637_v62 }
 0x3c4   : > { %2678 = vmatpush3.bf16.msra.mxu0 %v1550_v22  ;;  %2713 = vmatpush3.bf16.msra.mxu1 %v1550_v22 }
 0x3c5   : > { %v1639_v63 = vadd.f32 %v2942_v0, %v1638_v11  ;;  %2679 = vmatprep.subr.bf16.mxu0 %v1551_v4  ;;  %2706 = vmatprep.subr.bf16.mxu1 %v1551_v4 }
 0x3c7   : > { %v1640_v12 = vadd.f32 %v2944_v1, %v1639_v63 }
 0x3c8   : > { %2680 = vmatpush3.bf16.msra.mxu0 %v1551_v4  ;;  %2714 = vmatpush3.bf16.msra.mxu1 %v1551_v4  ;;  %v1660_v4 = vld [vmem:[#allocation4 + $0x40] sm:$0xff] }
 0x3c9   : > { %v1641_v21 = vadd.f32 %v2946_v6, %v1640_v12  ;;  %2681 = vmatprep.subr.bf16.mxu0 %v1552_v34  ;;  %2707 = vmatprep.subr.bf16.mxu1 %v1552_v34  ;;  %v1663_v6 = vld [vmem:[#allocation4 + $0x58] sm:$0xff]  ;;  %v1683_v12 = vmul.f32 %v3740_v29, %v1661_v10 }
 0x3ca   : > { %v1685_v62 = vmul.f32 %v3740_v29, %v1663_v6 }
 0x3cb   : > { %v1642_v47 = vadd.f32 %v2948_v8, %v1641_v21  ;;  %v1684_v8 = vmul.f32 %v3740_v29, %v1662_v37 }
 0x3cc   : > { %2682 = vmatpush3.bf16.msra.mxu0 %v1552_v34  ;;  %2715 = vmatpush3.bf16.msra.mxu1 %v1552_v34 }
 0x3cd   : > { %v1643_v40 = vadd.f32 %v2950_v36, %v1642_v47  ;;  %2683 = vmatprep.subr.bf16.mxu0 %v1553_v48  ;;  %2708 = vmatprep.subr.bf16.mxu1 %v1553_v48  ;;  %v1682_v36 = vmul.f32 %v3740_v29, %v1660_v4 }
 0x3cf   : > { %v1644_v3 = vrot.slane %v1643_v40, 4 }
 0x3d0   : > { %2684 = vmatpush3.bf16.msra.mxu0 %v1553_v48  ;;  %2716 = vmatpush3.bf16.msra.mxu1 %v1553_v48 }
 0x3d1   : > { %v1645_v51 = vadd.f32 %v1644_v3, %v1643_v40  ;;  %v1666_v40 = vld [vmem:[#allocation4 + $0x70] sm:$0xff]  ;;  %v1667_v3 = vld [vmem:[#allocation4 + $0x78] sm:$0xff] }
 0x3d3   : > { %v1646_v56 = vrot.slane %v1645_v51, 2  ;;  %2686 = vmatmul.mubr.bf16.vlgmr.msra.gmra.mrb[32].mxu0 %v3575_v5  ;;  %2690 = vmatmul.mubr.bf16.vlgmr.msra.gmra.mrb[16].mxu1 %v1701_v13  ;;  %v1656_v5 = vld [vmem:[#allocation4 + $0x20] sm:$0xff] }
 0x3d4   : > { %2693 = vmatprep.mubr.bf16.mxu1 %v1702_v44  ;;  %v1678_v43 = vmul.f32 %v3740_v29, %v1656_v5  ;;  %v1664_v44 = vld [vmem:[#allocation4 + $0x60] sm:$0xff] }
 0x3d5   : > { %v1647_v19 = vadd.f32 %v1646_v56, %v1645_v51  ;;  %v1688_v51 = vmul.f32 %v3740_v29, %v1666_v40  ;;  %v1665_v56 = vld [vmem:[#allocation4 + $0x68] sm:$0xff]  ;;  %v1884_v5 = vld [vmem:[%s4054_s8] sm:$0xff] (!%p2392_p12) }
 0x3d6   : > { %1902 = vperm.xlu0 (!%p2392_p12), %2951, %v1884_v5  }
 0x3d7   : > { %v1648_v25 = vrot.slane %v1647_v19, 1 }
 0x3d9   : > { %v1649_v27 = vadd.f32 %v1648_v25, %v1647_v19  ;;  %v1686_v19 = vmul.f32 %v3740_v29, %v1664_v44 }
 0x3da   : > { %1907 = vperm.xlu0 (!%p2392_p12), %2951, %v1885_v32  }
 0x3db   : > { %v1650_v17 = vadd.f32 %v1649_v27, %v1628_v15  ;;  %2694 = vmatmul.mubr.bf16.gmra.mrb[20].mxu1 %v1703_v59  ;;  %v1689_v15 = vmul.f32 %v3740_v29, %v1667_v3 }
 0x3dc   : > { %2697 = vmatprep.mubr.bf16.mxu1 %v1704_v14 }
 0x3dd   : > { %1651 = vst [vmem:[#allocation3] sm:$0x1] %v1650_v17  ;;  %v1687_v17 = vmul.f32 %v3740_v29, %v1665_v56  ;;  %v1887_v29 = vld [vmem:[%s4054_s8 + $0x18] sm:$0xff] (!%p2392_p12) }
 0x3de   : > { %1917 = vperm.xlu1 (!%p2392_p12), %2952, %v1887_v29   ;;  %1922 = vperm.xlu0 (!%p2392_p12), %2951, %v1888_v35  }
 0x3e3   : > { %2698 = vmatmul.mubr.bf16.gmra.mrb[24].mxu1 %v1705_v33 }
 0x4a6   : > { %v2687_v39 = vpop.f32.mrb[32].mxu0  ;;  %v2691_v42 = vpop.f32.mrb[16].mxu1 }
 0x4a7   : > { %v1805_v7 = vadd.f32 %v2687_v39, %v1676_v31  ;;  %v1809_v45 = vadd.f32 %v2691_v42, %v1680_v38  ;;  %v1740_v46 = vpop.f32.mrb[33].mxu0  ;;  %v1756_v50 = vpop.f32.mrb[17].mxu1  ;;  %v1842_v31 = vld [vmem:[#allocation3] sm:$0x1] (!%p2392_p12)  ;;  %v1889_v38 = vld [vmem:[%s4054_s8 + $0x28] sm:$0xff] (!%p2392_p12)  ;;  %v1890_v39 = vld [vmem:[%s4054_s8 + $0x30] sm:$0xff] (!%p2392_p12) }
 0x4a8   : > { %v1803_v52 = vadd.f32 %v1740_v46, %v1674_v18  ;;  %v1807_v53 = vadd.f32 %v1756_v50, %v1678_v43  ;;  %v2688_v55 = vpop.f32.mrb[34].mxu0  ;;  %v2692_v23 = vpop.f32.mrb[18].mxu1  ;;  %2953 = vrcp.f32 (!%p2392_p12), %v1842_v31  ;;  %1927 = vperm.xlu1 (!%p2392_p12), %2952, %v1889_v38   ;;  %1932 = vperm.xlu0 (!%p2392_p12), %2951, %v1890_v39   ;;  %v1893_v42 = vld [vmem:[%s4054_s8 + $0x48] sm:$0xff] (!%p2392_p12)  ;;  %v1892_v18 = vld [vmem:[%s4054_s8 + $0x40] sm:$0xff] (!%p2392_p12) }
 0x4a9   : > { %1821 = vst [vmem:[#allocation4 + $0x10] sm:$0xff] %v1805_v7  ;;  %1825 = vst [vmem:[#allocation4 + $0x30] sm:$0xff] %v1809_v45  ;;  %v1806_v60 = vadd.f32 %v2688_v55, %v1677_v54  ;;  %v1810_v9 = vadd.f32 %v2692_v23, %v1681_v16  ;;  %v1743_v61 = vpop.f32.mrb[35].mxu0  ;;  %v1759_v22 = vpop.f32.mrb[19].mxu1  ;;  %v1895_v7 = vld [vmem:[%s4054_s8 + $0x58] sm:$0xff] (!%p2392_p12)  ;;  %v1894_v45 = vld [vmem:[%s4054_s8 + $0x50] sm:$0xff] (!%p2392_p12) }
 0x4aa   : > { %1819 = vst [vmem:[#allocation4] sm:$0xff] %v1803_v52  ;;  %1823 = vst [vmem:[#allocation4 + $0x20] sm:$0xff] %v1807_v53  ;;  %v1804_v0 = vadd.f32 %v1743_v61, %v1675_v57  ;;  %v1808_v1 = vadd.f32 %v1759_v22, %v1679_v58  ;;  %v1897_v46 = vld [vmem:[%s4054_s8 + $0x68] sm:$0xff] (!%p2392_p12)  ;;  %v1896_v50 = vld [vmem:[%s4054_s8 + $0x60] sm:$0xff] (!%p2392_p12)  ;;  %v1913_v58 = vpop.permute.xlu1 (!%p2392_p12), %1912 }
 0x4ab   : > { %1822 = vst [vmem:[#allocation4 + $0x18] sm:$0xff] %v1806_v60  ;;  %1826 = vst [vmem:[#allocation4 + $0x38] sm:$0xff] %v1810_v9  ;;  %v1899_v54 = vld [vmem:[%s4054_s8 + $0x78] sm:$0xff] (!%p2392_p12)  ;;  %v1898_v16 = vld [vmem:[%s4054_s8 + $0x70] sm:$0xff] (!%p2392_p12)  ;;  %v1903_v9 = vpop.permute.xlu0 (!%p2392_p12), %1902 }
 0x4ac   : > { %1820 = vst [vmem:[#allocation4 + $0x8] sm:$0xff] %v1804_v0  ;;  %1824 = vst [vmem:[#allocation4 + $0x28] sm:$0xff] %v1808_v1  ;;  %1937 = vperm.xlu1 (!%p2392_p12), %2952, %v1891_v41   ;;  %1942 = vperm.xlu0 (!%p2392_p12), %2951, %v1892_v18   ;;  %v2017_v52 = vld [vmem:[#allocation7] sm:$0x1] (!%p2392_p12)  ;;  %v1840_v53 = vld [vmem:[#allocation2] sm:$0x1] (!%p2392_p12) }
 0x4ad   : > { %1841 = vst [vmem:[#allocation12] sm:$0x1] (!%p2392_p12), %v1840_v53 }
 0x4ae   : > { %v2695_v34 = vpop.f32.mrb[20].mxu1  ;;  %v1918_v37 = vpop.permute.xlu1 (!%p2392_p12), %1917 }
 0x4af   : > { %v1813_v49 = vadd.f32 %v2695_v34, %v1684_v8  ;;  %v1772_v48 = vpop.f32.mrb[21].mxu1  ;;  %v1908_v4 = vpop.permute.xlu0 (!%p2392_p12), %1907 }
 0x4b0   : > { %v1811_v11 = vadd.f32 %v1772_v48, %v1682_v36  ;;  %v2696_v63 = vpop.f32.mrb[22].mxu1  ;;  %1947 = vperm.xlu1 (!%p2392_p12), %2952, %v1893_v42   ;;  %1952 = vperm.xlu0 (!%p2392_p12), %2951, %v1894_v45   ;;  %v1848_v60 = vld [vmem:[#allocation4 + $0x10] sm:$0xff] (!%p2392_p12) }
 0x4b1   : > { %1829 = vst [vmem:[#allocation4 + $0x50] sm:$0xff] %v1813_v49  ;;  %v1814_v13 = vadd.f32 %v2696_v63, %v1685_v62  ;;  %v1775_v21 = vpop.f32.mrb[23].mxu1  ;;  %v1846_v23 = vld [vmem:[#allocation4] sm:$0xff] (!%p2392_p12) }
 0x4b2   : > { %1827 = vst [vmem:[#allocation4 + $0x40] sm:$0xff] %v1811_v11  ;;  %v1812_v47 = vadd.f32 %v1775_v21, %v1683_v12  ;;  %v2954_v43 = vpop.eup (!%p2392_p12), %2953  ;;  %v1849_v0 = vld [vmem:[#allocation4 + $0x18] sm:$0xff] (!%p2392_p12)  ;;  %v1850_v6 = vld [vmem:[#allocation4 + $0x20] sm:$0xff] (!%p2392_p12)  ;;  %v1852_v12 = vld [vmem:[#allocation4 + $0x30] sm:$0xff] (!%p2392_p12) }
 0x4b3   : > { %1830 = vst [vmem:[#allocation4 + $0x58] sm:$0xff] %v1814_v13  ;;  %1845 = vst [vmem:[#allocation13] sm:$0x1] (!%p2392_p12), %v2954_v43  ;;  %v3818_v55 = vrot.slane (!%p2392_p12), %v2954_v43, %v3716_v2  ;;  %v1847_v57 = vld [vmem:[#allocation4 + $0x8] sm:$0xff] (!%p2392_p12)  ;;  %v1923_v63 = vpop.permute.xlu0 (!%p2392_p12), %1922  ;;  %v1853_v40 = vld [vmem:[#allocation4 + $0x38] sm:$0xff] (!%p2392_p12) }
 0x4b4   : > { %1828 = vst [vmem:[#allocation4 + $0x48] sm:$0xff] %v1812_v47  ;;  %1957 = vperm.xlu1 (!%p2392_p12), %2952, %v1895_v7   ;;  %1962 = vperm.xlu0 (!%p2392_p12), %2951, %v1896_v50   ;;  %v1851_v36 = vld [vmem:[#allocation4 + $0x28] sm:$0xff] (!%p2392_p12) }
 0x4b5   : > { %v1868_v61 = vmul.f32 (!%p2392_p12), %v3818_v55, %v1846_v23  ;;  %v1869_v22 = vmul.f32 (!%p2392_p12), %v3818_v55, %v1847_v57  ;;  %v1870_v1 = vmul.f32 (!%p2392_p12), %v3818_v55, %v1848_v60  ;;  %v1871_v10 = vmul.f32 (!%p2392_p12), %v3818_v55, %v1849_v0 }
 0x4b6   : > { %v2699_v59 = vpop.f32.mrb[24].mxu1  ;;  %1839 = sbr.rel (%p2392_p12) target bundleno = 1385 (0x569), region = 64  ;;  %v1872_v62 = vmul.f32 (!%p2392_p12), %v3818_v55, %v1850_v6  ;;  %v1873_v47 = vmul.f32 (!%p2392_p12), %v3818_v55, %v1851_v36 }
 0x4b7   : > { %v1817_v24 = vadd.f32 %v2699_v59, %v1688_v51  ;;  %v1788_v25 = vpop.f32.mrb[25].mxu1  ;;  %v1980_v8 = vmul.f32 (!%p2392_p12), %v1903_v9, %v1868_v61  ;;  %v1981_v34 = vmul.f32 (!%p2392_p12), %v1908_v4, %v1869_v22  ;;  %v1982_v49 = vmul.f32 (!%p2392_p12), %v1913_v58, %v1870_v1 }
 0x4b8   : > { %v1815_v27 = vadd.f32 %v1788_v25, %v1686_v19  ;;  %v2700_v14 = vpop.f32.mrb[26].mxu1  ;;  %1967 = vperm.xlu1 (!%p2392_p12), %2952, %v1897_v46   ;;  %1972 = vperm.xlu0 (!%p2392_p12), %2951, %v1898_v16   ;;  %v1983_v13 = vmul.f32 (!%p2392_p12), %v1918_v37, %v1871_v10  ;;  %v1984_v44 = vmul.f32 (!%p2392_p12), %v1923_v63, %v1872_v62  ;;  %v1856_v28 = vld [vmem:[#allocation4 + $0x50] sm:$0xff] (!%p2392_p12) }
 0x4b9   : > { %1833 = vst [vmem:[#allocation4 + $0x70] sm:$0xff] %v1817_v24  ;;  %v1818_v33 = vadd.f32 %v2700_v14, %v1689_v15  ;;  %v1791_v20 = vpop.f32.mrb[27].mxu1  ;;  %v1996_v48 = vadd.f32 (!%p2392_p12), %v1981_v34, %v1980_v8  ;;  %v1874_v51 = vmul.f32 (!%p2392_p12), %v3818_v55, %v1852_v12  ;;  %v1854_v19 = vld [vmem:[#allocation4 + $0x40] sm:$0xff] (!%p2392_p12)  ;;  %v1875_v15 = vmul.f32 (!%p2392_p12), %v3818_v55, %v1853_v40 }
 0x4ba   : > { %1831 = vst [vmem:[#allocation4 + $0x60] sm:$0xff] %v1815_v27  ;;  %v1816_v26 = vadd.f32 %v1791_v20, %v1687_v17  ;;  %v1857_v32 = vld [vmem:[#allocation4 + $0x58] sm:$0xff] (!%p2392_p12)  ;;  %v1878_v35 = vmul.f32 (!%p2392_p12), %v3818_v55, %v1856_v28 }
 0x4bb   : > { %1834 = vst [vmem:[#allocation4 + $0x78] sm:$0xff] %v1818_v33  ;;  %v1997_v21 = vadd.f32 (!%p2392_p12), %v1996_v48, %v1982_v49  ;;  %v1855_v27 = vld [vmem:[#allocation4 + $0x48] sm:$0xff] (!%p2392_p12)  ;;  %v1876_v33 = vmul.f32 (!%p2392_p12), %v3818_v55, %v1854_v19  ;;  %v1879_v7 = vmul.f32 (!%p2392_p12), %v3818_v55, %v1857_v32 }
 0x4bc   : > { %1832 = vst [vmem:[#allocation4 + $0x68] sm:$0xff] %v1816_v26  ;;  %1977 = vperm.xlu1 (!%p2392_p12), %2952, %v1899_v54   ;;  %2020 = vperm.xlu0 (!%p2392_p12), %2951, %v2017_v52   ;;  %v1877_v29 = vmul.f32 (!%p2392_p12), %v3818_v55, %v1855_v27 }
 0x4bd   : > { %v1998_v3 = vadd.f32 %v1997_v21, %v1983_v13 }
 0x4bf   : > { %v1999_v25 = vadd.f32 %v1998_v3, %v1984_v44 }
 0x4c0   : > { %v1860_v53 = vld [vmem:[#allocation4 + $0x70] sm:$0xff] }
 0x4c1   : > { %v1858_v42 = vld [vmem:[#allocation4 + $0x60] sm:$0xff]  ;;  %v1882_v22 = vmul.f32 %v3818_v55, %v1860_v53 }
 0x4c2   : > { %v1880_v54 = vmul.f32 %v3818_v55, %v1858_v42  ;;  %v1861_v60 = vld [vmem:[#allocation4 + $0x78] sm:$0xff] }
 0x4c3   : > { %v1859_v45 = vld [vmem:[#allocation4 + $0x68] sm:$0xff]  ;;  %v1883_v4 = vmul.f32 %v3818_v55, %v1861_v60 }
 0x4c4   : > { %v1881_v58 = vmul.f32 %v3818_v55, %v1859_v45 }
 0x527   : > { %v1928_v11 = vpop.permute.xlu1 %1927  ;;  %v1933_v59 = vpop.permute.xlu0 %1932 }
 0x528   : > { %v1985_v24 = vmul.f32 %v1928_v11, %v1873_v47  ;;  %v1986_v14 = vmul.f32 %v1933_v59, %v1874_v51 }
 0x52a   : > { %v2000_v17 = vadd.f32 %v1999_v25, %v1985_v24 }
 0x52b   : > { %v1938_v56 = vpop.permute.xlu1 %1937  ;;  %v1943_v26 = vpop.permute.xlu0 %1942 }
 0x52c   : > { %v1987_v5 = vmul.f32 %v1938_v56, %v1875_v15  ;;  %v2001_v30 = vadd.f32 %v2000_v17, %v1986_v14  ;;  %v1988_v31 = vmul.f32 %v1943_v26, %v1876_v33 }
 0x52e   : > { %v2002_v38 = vadd.f32 %v2001_v30, %v1987_v5 }
 0x52f   : > { %v1948_v20 = vpop.permute.xlu1 %1947  ;;  %v1953_v39 = vpop.permute.xlu0 %1952 }
 0x530   : > { %v1989_v18 = vmul.f32 %v1948_v20, %v1877_v29  ;;  %v2003_v43 = vadd.f32 %v2002_v38, %v1988_v31  ;;  %v1990_v46 = vmul.f32 %v1953_v39, %v1878_v35 }
 0x532   : > { %v2004_v50 = vadd.f32 %v2003_v43, %v1989_v18 }
 0x533   : > { %v1958_v41 = vpop.permute.xlu1 %1957  ;;  %v1963_v52 = vpop.permute.xlu0 %1962 }
 0x534   : > { %v1991_v23 = vmul.f32 %v1958_v41, %v1879_v7  ;;  %v2005_v57 = vadd.f32 %v2004_v50, %v1990_v46  ;;  %v1992_v9 = vmul.f32 %v1963_v52, %v1880_v54 }
 0x536   : > { %v2006_v61 = vadd.f32 %v2005_v57, %v1991_v23 }
 0x537   : > { %v1968_v16 = vpop.permute.xlu1 %1967  ;;  %v1973_v0 = vpop.permute.xlu0 %1972 }
 0x538   : > { %v1993_v1 = vmul.f32 %v1968_v16, %v1881_v58  ;;  %v2007_v37 = vadd.f32 %v2006_v61, %v1992_v9  ;;  %v1994_v8 = vmul.f32 %v1973_v0, %v1882_v22 }
 0x53a   : > { %v2008_v10 = vadd.f32 %v2007_v37, %v1993_v1 }
 0x53b   : > { %v1978_v6 = vpop.permute.xlu1 %1977  ;;  %v2021_v12 = vpop.permute.xlu0 %2020 }
 0x53c   : > { %v1995_v34 = vmul.f32 %v1978_v6, %v1883_v4  ;;  %v2009_v36 = vadd.f32 %v2008_v10, %v1994_v8  ;;  %v2026_v47 = vrot.slane %v2021_v12, %v3716_v2 }
 0x53e   : > { %v2010_v49 = vadd.f32 %v2009_v36, %v1995_v34 }
 0x540   : > { %v2011_v48 = vrot.slane %v2010_v49, 4 }
 0x542   : > { %v2012_v62 = vadd.f32 %v2011_v48, %v2010_v49 }
 0x544   : > { %v2013_v11 = vrot.slane %v2012_v62, 2 }
 0x546   : > { %v2014_v63 = vadd.f32 %v2013_v11, %v2012_v62 }
 0x548   : > { %v2015_v13 = vrot.slane %v2014_v63, 1 }
 0x54a   : > { %v2016_v21 = vadd.f32 %v2015_v13, %v2014_v63 }
 0x54c   : > { %v2027_v40 = vadd.f32 %v2026_v47, %v2016_v21 }
 0x54e   : > { %2028 = vst [vmem:[#allocation15] sm:$0x1] %v2027_v40  ;;  %v2393_v44 = vmul.f32 -1.442695, %v2027_v40 }
 0x550   : > { %2955 = vpow2.f32 %v2393_v44 }
 0x55a   : > { %v2956_v55 = vpop.eup %2955 }
 0x55b   : > { %v2032_v3 = vadd.f32 1.0, %v2956_v55 }
 0x55d   : > { %2957 = vrcp.f32 %v2032_v3 }
 0x567   : > { %v2958_v51 = vpop.eup %2957 }
 0x568   : > { %2035 = vst [vmem:[#allocation16] sm:$0x1] %v2958_v51 }
 0x569 PF: > { %s4069_s17 = sand.u32 1, %s3325_s9   ;;  %s2443_s18 = sshll.u32 %s3325_s9, 10 }
 0x56a   : > { %s3842_s25 = scalar_lea.hbm %s4056_s10, %s2443_s18  ;;  %s2059_s22 = sshll.u32 %s3366_s19, 4  ;;  %s3845_s22 = int_to_ptr.vmem [resolvable:$true] %s2059_s22 }
 0x56b   : > { %s3850_s24 = scalar_lea.hbm %s4062_s16, %s2443_s18  ;;  %s3854_s26 = scalar_lea.sflag [#allocation9], %s4069_s17 }
 0x56c   : > { %s2959_s4 = scalar_lea.vmem %s3845_s22, 1024  ;;  %s3207_s2 = smov [#allocation8]  }
 0x56d   : > { %p2960_p13 = scmp.ne.s32.totalorder %s3845_s22, %s2959_s4  ;;  %s2963_s19 = sshll.u32 %s3207_s2, 4  ;;  %s2964_s19 = int_to_ptr.vmem [resolvable:$false] %s2963_s19 }
 0x56e   : > { %s2965_s3 = scalar_lea.vmem %s2964_s19, 2048  ;;  %p2966_p3 = scmp.lt.s32.totalorder %s3845_s22, %s2964_s19 }
 0x56f   : > { %p2961_p0 = pnand %p2960_p13, %p3345_p5  ;;  %p2967_p4 = scmp.lt.s32.totalorder %s2965_s3, %s2959_s4 }
 0x571   : > { %p2962_p1 = pneg %p2961_p0  ;;  %p2968_p7 = por %p2967_p4, %p2966_p3 }
 0x573   : > { %p2969_p8 = pnand %p2968_p7, %p2962_p1 }
 0x575   : > { %2972 = shalt.err (!%p2969_p8)
}
 0x576   : > { %s2973_s18 = scalar_lea.hbm %s3842_s25, 1024  ;;  %s2977_s2 = scalar_lea.hbm %s4056_s10, 2048 }
 0x577   : > { %p2974_p9 = scmp.ne.s32.totalorder %s3842_s25, %s2973_s18  ;;  %p2978_p12 = scmp.lt.u32.totalorder %s3842_s25, %s4056_s10 }
 0x578   : > { %p2979_p13 = scmp.lt.u32.totalorder %s2977_s2, %s2973_s18  ;;  %p2981_p1 = scmp.lt.u32.totalorder %s2973_s18, %s3842_s25 }
 0x579   : > { %p2975_p10 = pnand %p2974_p9, %p3345_p5 }
 0x57a   : > { %p2980_p0 = por %p2979_p13, %p2978_p12 }
 0x57b   : > { %p2976_p11 = pneg %p2975_p10 }
 0x57c   : > { %p2982_p3 = por %p2981_p1, %p2980_p0 }
 0x57e   : > { %p2983_p4 = pnand %p2982_p3, %p2976_p11 }
 0x580   : > { %2986 = shalt.err (!%p2983_p4)
}
 0x581   : > { %s3208_s4 = smov 4   ;;  %s4091_s3 = smov 64  }
 0x582   : > { %2717 = dma.vmem_to_hbm [thread:$0]  (%p3345_p5), %s3845_s22, 1024, %s3842_s25, %s3854_s26, %s4091_s3, %s4091_s3, %s3208_s4  }
 0x583   : > { %s3885_s18 = scalar_lea.hbm %s4057_s11, %s3357_s23  ;;  %s2075_s30 = sshll.u32 %s3368_s28, 4  ;;  %s3888_s30 = int_to_ptr.vmem [resolvable:$true] %s2075_s30 }
 0x584   : > { %s3209_s2 = smov [#allocation13]   ;;  %s4092_s5 = sand.u32 1, %s3325_s9  }
 0x585   : > { %s3890_s19 = sshll.u32 %s3209_s2, 4  ;;  %s2042_s6 = scalar_lea.sflag [#allocation11], %s4092_s5  ;;  %s2098_s19 = int_to_ptr.vmem [resolvable:$true] %s3890_s19 }
 0x586   : > { %s2987_s7 = scalar_lea.vmem %s3888_s30, 16  ;;  %s3210_s25 = smov [#allocation10]  }
 0x587   : > { %p2988_p7 = scmp.ne.s32.totalorder %s3888_s30, %s2987_s7  ;;  %s2991_s22 = sshll.u32 %s3210_s25, 4  ;;  %s2992_s22 = int_to_ptr.vmem [resolvable:$false] %s2991_s22 }
 0x588   : > { %s2993_s23 = scalar_lea.vmem %s2992_s22, 32  ;;  %p2994_p10 = scmp.lt.s32.totalorder %s3888_s30, %s2992_s22 }
 0x589   : > { %p2989_p8 = pnand %p2988_p7, %p3345_p5  ;;  %p2995_p11 = scmp.lt.s32.totalorder %s2993_s23, %s2987_s7 }
 0x58b   : > { %p2990_p9 = pneg %p2989_p8  ;;  %p2996_p12 = por %p2995_p11, %p2994_p10 }
 0x58d   : > { %p2997_p13 = pnand %p2996_p12, %p2990_p9 }
 0x58f   : > { %3000 = shalt.err (!%p2997_p13)
}
 0x590   : > { %s3001_s5 = scalar_lea.hbm %s3885_s18, 16  ;;  %s3005_s1 = scalar_lea.hbm %s4057_s11, 32 }
 0x591   : > { %p3002_p0 = scmp.ne.s32.totalorder %s3885_s18, %s3001_s5  ;;  %p3006_p4 = scmp.lt.u32.totalorder %s3885_s18, %s4057_s11 }
 0x592   : > { %p3007_p7 = scmp.lt.u32.totalorder %s3005_s1, %s3001_s5  ;;  %p3009_p9 = scmp.lt.u32.totalorder %s3001_s5, %s3885_s18 }
 0x593   : > { %p3003_p1 = pnand %p3002_p0, %p3345_p5 }
 0x594   : > { %p3008_p8 = por %p3007_p7, %p3006_p4 }
 0x595   : > { %p3004_p3 = pneg %p3003_p1 }
 0x596   : > { %p3010_p10 = por %p3009_p9, %p3008_p8 }
 0x598   : > { %p3011_p11 = pnand %p3010_p10, %p3004_p3 }
 0x59a   : > { %3014 = shalt.err (!%p3011_p11)
}
 0x59b   : > { %2718 = dma.vmem_to_hbm [thread:$0]  (%p3345_p5), %s3888_s30, 16, %s3885_s18, %s2042_s6  }
 0x59c   : > { %s3015_s7 = scalar_lea.vmem %s2098_s19, 16  ;;  %s3021_s22 = scalar_lea.vmem %s2098_s19, 32 }
 0x59d   : > { %p3016_p12 = scmp.ne.s32.totalorder %s2098_s19, %s3015_s7  ;;  %p3022_p1 = scmp.lt.s32.totalorder %s2098_s19, %s2098_s19 }
 0x59e   : > { %p3023_p4 = scmp.lt.s32.totalorder %s3021_s22, %s3015_s7 }
 0x59f   : > { %p3017_p13 = pnand %p3016_p12, %p250_p2 }
 0x5a0   : > { %p3024_p7 = por %p3023_p4, %p3022_p1 }
 0x5a1   : > { %p3018_p0 = pneg %p3017_p13 }
 0x5a3   : > { %p3025_p8 = pnand %p3024_p7, %p3018_p0 }
 0x5a5   : > { %3028 = shalt.err (!%p3025_p8)
}
 0x5a6   : > { %s3029_s28 = scalar_lea.hbm %s4059_s13, 16 }
 0x5a7   : > { %p3030_p3 = scmp.ne.s32.totalorder %s4059_s13, %s3029_s28  ;;  %p3035_p11 = scmp.lt.u32.totalorder %s3029_s28, %s4059_s13 }
 0x5a9   : > { %p3031_p9 = pnand %p3030_p3, %p250_p2 }
 0x5ab   : > { %p3032_p10 = pneg %p3031_p9 }
 0x5ad   : > { %p3037_p12 = pnand %p3035_p11, %p3032_p10 }
 0x5af   : > { %3040 = shalt.err (!%p3037_p12)
}
 0x5b0   : > { %2722 = dma.vmem_to_hbm [thread:$0]  (%p250_p2), %s2098_s19, 16, %s4059_s13, [#allocation14]  }
 0x5b1   : > { %s3211_s25 = smov [#allocation12]   ;;  %s3212_s22 = smov [#allocation15]  }
 0x5b2   : > { %s2086_s7 = sshll.u32 %s3211_s25, 4  ;;  %s2108_s23 = sshll.u32 %s3212_s22, 4  ;;  %s2087_s7 = int_to_ptr.vmem [resolvable:$true] %s2086_s7  ;;  %s2109_s23 = int_to_ptr.vmem [resolvable:$true] %s2108_s23 }
 0x5b3   : > { %s3041_s5 = scalar_lea.vmem %s2087_s7, 16  ;;  %s3047_s28 = scalar_lea.vmem %s2087_s7, 32 }
 0x5b4   : > { %p3042_p13 = scmp.ne.s32.totalorder %s2087_s7, %s3041_s5  ;;  %p3048_p4 = scmp.lt.s32.totalorder %s2087_s7, %s2087_s7 }
 0x5b5   : > { %p3049_p7 = scmp.lt.s32.totalorder %s3047_s28, %s3041_s5 }
 0x5b6   : > { %p3043_p0 = pnand %p3042_p13, %p250_p2 }
 0x5b7   : > { %p3050_p8 = por %p3049_p7, %p3048_p4 }
 0x5b8   : > { %p3044_p1 = pneg %p3043_p0 }
 0x5ba   : > { %p3051_p3 = pnand %p3050_p8, %p3044_p1 }
 0x5bc   : > { %3054 = shalt.err (!%p3051_p3)
}
 0x5bd   : > { %s3055_s19 = scalar_lea.hbm %s4058_s12, 16 }
 0x5be   : > { %p3056_p9 = scmp.ne.s32.totalorder %s4058_s12, %s3055_s19  ;;  %p3061_p12 = scmp.lt.u32.totalorder %s3055_s19, %s4058_s12 }
 0x5c0   : > { %p3057_p10 = pnand %p3056_p9, %p250_p2 }
 0x5c2   : > { %p3058_p11 = pneg %p3057_p10 }
 0x5c4   : > { %p3063_p13 = pnand %p3061_p12, %p3058_p11 }
 0x5c6   : > { %3066 = shalt.err (!%p3063_p13)
}
 0x5c7   : > { %2720 = dma.vmem_to_hbm [thread:$0]  (%p250_p2), %s2087_s7, 16, %s4058_s12, [#allocation11]  }
 0x5c8   : > { %s3067_s5 = scalar_lea.vmem %s2109_s23, 16  ;;  %s3073_s28 = scalar_lea.vmem %s2109_s23, 32 }
 0x5c9   : > { %p3068_p0 = scmp.ne.s32.totalorder %s2109_s23, %s3067_s5  ;;  %p3074_p7 = scmp.lt.s32.totalorder %s2109_s23, %s2109_s23 }
 0x5ca   : > { %p3075_p8 = scmp.lt.s32.totalorder %s3073_s28, %s3067_s5 }
 0x5cb   : > { %p3069_p1 = pnand %p3068_p0, %p250_p2 }
 0x5cc   : > { %p3076_p3 = por %p3075_p8, %p3074_p7 }
 0x5cd   : > { %p3070_p4 = pneg %p3069_p1 }
 0x5cf   : > { %p3077_p9 = pnand %p3076_p3, %p3070_p4 }
 0x5d1   : > { %3080 = shalt.err (!%p3077_p9)
}
 0x5d2   : > { %s3081_s19 = scalar_lea.hbm %s4060_s14, 16 }
 0x5d3   : > { %p3082_p10 = scmp.ne.s32.totalorder %s4060_s14, %s3081_s19  ;;  %p3087_p13 = scmp.lt.u32.totalorder %s3081_s19, %s4060_s14 }
 0x5d5   : > { %p3083_p11 = pnand %p3082_p10, %p250_p2 }
 0x5d7   : > { %p3084_p12 = pneg %p3083_p11 }
 0x5d9   : > { %p3089_p0 = pnand %p3087_p13, %p3084_p12 }
 0x5db   : > { %3092 = shalt.err (!%p3089_p0)
}
 0x5dc   : > { %2724 = dma.vmem_to_hbm [thread:$0]  (%p250_p2), %s2109_s23, 16, %s4060_s14, [#allocation14]  }
 0x5dd   : > { %s3213_s22 = smov [#allocation16]   ;;  %s2132_s28 = sshll.u32 %s3370_s0, 4  ;;  %s3971_s28 = int_to_ptr.vmem [resolvable:$true] %s2132_s28 }
 0x5de   : > { %s2119_s5 = sshll.u32 %s3213_s22, 4  ;;  %s2120_s5 = int_to_ptr.vmem [resolvable:$true] %s2119_s5 }
 0x5df   : > { %s3093_s17 = scalar_lea.vmem %s2120_s5, 16  ;;  %s3099_s1 = scalar_lea.vmem %s2120_s5, 32 }
 0x5e0   : > { %p3094_p1 = scmp.ne.s32.totalorder %s2120_s5, %s3093_s17  ;;  %p3100_p8 = scmp.lt.s32.totalorder %s2120_s5, %s2120_s5 }
 0x5e1   : > { %p3101_p3 = scmp.lt.s32.totalorder %s3099_s1, %s3093_s17 }
 0x5e2   : > { %p3095_p4 = pnand %p3094_p1, %p250_p2 }
 0x5e3   : > { %p3102_p9 = por %p3101_p3, %p3100_p8 }
 0x5e4   : > { %p3096_p7 = pneg %p3095_p4 }
 0x5e6   : > { %p3103_p10 = pnand %p3102_p9, %p3096_p7 }
 0x5e8   : > { %3106 = shalt.err (!%p3103_p10)
}
 0x5e9   : > { %s3107_s23 = scalar_lea.hbm %s4061_s15, 16 }
 0x5ea   : > { %p3108_p11 = scmp.ne.s32.totalorder %s4061_s15, %s3107_s23  ;;  %p3113_p0 = scmp.lt.u32.totalorder %s3107_s23, %s4061_s15 }
 0x5ec   : > { %p3109_p12 = pnand %p3108_p11, %p250_p2 }
 0x5ee   : > { %p3110_p13 = pneg %p3109_p12 }
 0x5f0   : > { %p3115_p1 = pnand %p3113_p0, %p3110_p13 }
 0x5f2   : > { %3118 = shalt.err (!%p3115_p1)
}
 0x5f3   : > { %2726 = dma.vmem_to_hbm [thread:$0]  (%p250_p2), %s2120_s5, 16, %s4061_s15, [#allocation17]  }
 0x5f4   : > { %s3119_s22 = scalar_lea.vmem %s3971_s28, 1024  ;;  %s3214_s17 = smov [#allocation18]  }
 0x5f5   : > { %p3120_p4 = scmp.ne.s32.totalorder %s3971_s28, %s3119_s22  ;;  %s3123_s1 = sshll.u32 %s3214_s17, 4  ;;  %s3124_s1 = int_to_ptr.vmem [resolvable:$false] %s3123_s1 }
 0x5f6   : > { %s3125_s19 = scalar_lea.vmem %s3124_s1, 2048  ;;  %p3126_p3 = scmp.lt.s32.totalorder %s3971_s28, %s3124_s1 }
 0x5f7   : > { %p3121_p7 = pnand %p3120_p4, %p3345_p5  ;;  %p3127_p9 = scmp.lt.s32.totalorder %s3125_s19, %s3119_s22 }
 0x5f9   : > { %p3122_p8 = pneg %p3121_p7  ;;  %p3128_p10 = por %p3127_p9, %p3126_p3 }
 0x5fb   : > { %p3129_p11 = pnand %p3128_p10, %p3122_p8 }
 0x5fd   : > { %3132 = shalt.err (!%p3129_p11)
}
 0x5fe   : > { %s3133_s5 = scalar_lea.hbm %s3850_s24, 1024  ;;  %s3137_s0 = scalar_lea.hbm %s4062_s16, 2048 }
 0x5ff   : > { %p3134_p12 = scmp.ne.s32.totalorder %s3850_s24, %s3133_s5  ;;  %p3138_p1 = scmp.lt.u32.totalorder %s3850_s24, %s4062_s16 }
 0x600   : > { %p3139_p4 = scmp.lt.u32.totalorder %s3137_s0, %s3133_s5  ;;  %p3141_p8 = scmp.lt.u32.totalorder %s3133_s5, %s3850_s24 }
 0x601   : > { %p3135_p13 = pnand %p3134_p12, %p3345_p5 }
 0x602   : > { %p3140_p7 = por %p3139_p4, %p3138_p1 }
 0x603   : > { %p3136_p0 = pneg %p3135_p13 }
 0x604   : > { %p3142_p3 = por %p3141_p8, %p3140_p7 }
 0x606   : > { %p3143_p9 = pnand %p3142_p3, %p3136_p0 }
 0x608   : > { %3146 = shalt.err (!%p3143_p9)
}
 0x609   : > { %2727 = dma.vmem_to_hbm [thread:$0]  (%p3345_p5), %s3971_s28, 1024, %s3850_s24, %s3854_s26, %s4091_s3, %s4091_s3, %s3208_s4  }
 0x60a   : > { %3164 = dma.done.wait (%p250_p2), [#allocation11], 16  }
 0x60b   : > { %3166 = vsyncadd (%p250_p2), [#allocation11], 4294967280 }
 0x60c   : > { %3168 = dma.done.wait (%p250_p2), [#allocation14], 32  }
 0x60d   : > { %3170 = vsyncadd (%p250_p2), [#allocation14], 4294967264 }
 0x60e   : > { %3172 = dma.done.wait (%p250_p2), [#allocation17], 16  }
 0x60f   : > { %3174 = vsyncadd (%p250_p2), [#allocation17], 4294967280 }
 0x610 PF: > { %p2757_p5 = scmp.ge.s32.totalorder %s3201_s29, 2  ;;  %s4093_s20 = sadd.s32 4294967294, %s3201_s29  }
 0x611   : > { %s2163_s24 = sand.u32 1, %s4093_s20  }
 0x612   : > { %p2740_p10 = pnand %p2757_p5, %p3349_p6  ;;  %s2164_s26 = scalar_lea.sflag [#allocation9], %s2163_s24 }
 0x614   : > { %3176 = dma.done.wait (!%p2740_p10), %s2164_s26, 1024  }
 0x615   : > { %3178 = vsyncadd (!%p2740_p10), %s2164_s26, 4294966272  ;;  %s2173_s4 = scalar_lea.sflag [#allocation11], %s2163_s24 }
 0x616   : > { %3180 = dma.done.wait (!%p2740_p10), %s2173_s4, 16  }
 0x617   : > { %3182 = vsyncadd (!%p2740_p10), %s2173_s4, 4294967280 }
 0x618   : > { %3184 = dma.done.wait (!%p2740_p10), %s2164_s26, 1024  }
 0x619   : > { %3186 = vsyncadd (!%p2740_p10), %s2164_s26, 4294966272  ;;  %s4094_s29 = sld [smem:[#allocation26_spill]]  ;;  %s4095_s9 = sld [smem:[#allocation25_spill]] }
 0x61a   : > { %s4096_s28 = sld [smem:[#allocation27_spill]]  ;;  %s4097_s26 = smov %s3193_s27 }
 0x61f   : > { %p35_p2 = scmp.ge.s32.totalorder %s4094_s29, 4   ;;  %s4098_s27 = smov %s4095_s9 }
 0x621   :  { %37 = sbr.rel (!%p35_p2) target bundleno = 17 (0x11), region = 163 }
 0x628   :  { %2186 = vsyncpa [#allocation9], 1 }
 0x629   :  { %2188 = vsyncpa [#allocation9 + $0x1], 1 }
 0x62a   :  { %2189 = vsyncpa [#allocation11], 1 }
 0x62b   :  { %2191 = vsyncpa [#allocation11 + $0x1], 1 }
 0x62c   :  { %2192 = vsyncpa [#allocation14], 1 }
 0x62d   :  { %2193 = vsyncpa [#allocation17], 1 }

</bundles_post_ra>
